<compile_context>
chip_gen: v7x
topology: tpu7x:2x2x1
jax: 0.10.0
libtpu: 0.0.40
codegen_flags: <defaults>
</compile_context>

<pallas_src>
import math

import jax
import jax.numpy as jnp
from jax.experimental import pallas as pl
from jax.experimental.pallas import tpu as pltpu


def _round_up(x, m):
    return (x + m - 1) // m * m


# VMEM budget for the double-buffered working set: safe under v5e's 16 MiB default
# scoped limit and well under v7x's 64 MiB physical VMEM.
_VMEM_BUDGET_BYTES = 12 * 1024 * 1024


# -----------------------------------------------------------------------------------
# Kernels
# -----------------------------------------------------------------------------------
def _patch_embed_kernel(x_ref, w_ref, b_ref, o_ref):
    """Single-step form: (tm, K) x (K, Cout) + bias.

    The weight block index is constant over the grid, so the slab is DMA'd once and
    stays VMEM-resident; one big dot per step feeds the MXU with full-K operands."""
    o_ref[...] = (jnp.dot(x_ref[...], w_ref[...],
                          preferred_element_type=jnp.float32)
                  + b_ref[...]).astype(o_ref.dtype)


def _patch_embed_kernel_ksplit(x_ref, w_ref, b_ref, o_ref):
    """K-split fallback (only when the weight slab does not fit the VMEM budget).

    The output block index (i, 0) is constant over the k axis, so the f32 output block
    is VMEM-resident and doubles as the accumulator; bias is folded into k==0 init."""
    k = pl.program_id(1)
    partial = jnp.dot(x_ref[...], w_ref[...], preferred_element_type=jnp.float32)

    @pl.when(k == 0)
    def _():
        o_ref[...] = partial + b_ref[...]

    @pl.when(k > 0)
    def _():
        o_ref[...] += partial


# -----------------------------------------------------------------------------------
# Wrapper
# -----------------------------------------------------------------------------------
def prepare_patch_weight(weight, *, use_bf16=True):
    """Flatten PyTorch conv weight (Cout, Cin, p, p) -> (K_pad, Cout) slab.

    Call once at model init so XLA doesn't re-materialize the transpose every forward."""
    Cout, Cin, ph, pw = weight.shape
    K = Cin * ph * pw
    K_pad = _round_up(K, 128)
    w2d = weight.reshape(Cout, K).T                     # (K, Cout), matches patch flatten order
    if K_pad != K:
        w2d = jnp.pad(w2d, ((0, K_pad - K), (0, 0)))    # zero rows contribute nothing
    return w2d.astype(jnp.bfloat16 if use_bf16 else jnp.float32)


def patch_embedding_forward(X, weight, bias, patch_size, *, use_bf16=True,
                            w2d=None, force_k_split=False):
    """Pallas equivalent of:
         nn.Conv2d(C, C, kernel_size=p, stride=p)(X).flatten(2).transpose(1, 2)

    X:      (B, C_in, H, W)         float32
    weight: (C_out, C_in, p, p)     PyTorch conv weight layout
    bias:   (C_out,)
    w2d:    optional pre-flattened (K_pad, C_out) weight from prepare_patch_weight()
    returns (B, num_patches, C_out) float32
    """
    B, C, H, W = X.shape
    p = patch_size
    Hp, Wp = H // p, W // p
    NP = Hp * Wp
    Cout = weight.shape[0]
    K = C * p * p
    K_pad = _round_up(K, 128)
    M = B * NP

    compute_dtype = jnp.bfloat16 if use_bf16 else jnp.float32
    itemsize = jnp.dtype(compute_dtype).itemsize

    # ---- layout plumbing (wrapper side): patchify (+ fused bf16 cast) --------------
    # patches[b*NP + (i*Wp + j), ci*p*p + ki*p + kj] = X[b, ci, i*p+ki, j*p+kj]
    # TODO(synk): for very large images, move this gather into the kernel (grid over
    # (b, patch-row) with a raw NCHW BlockSpec) to avoid the extra HBM pass.
    patches = (X.reshape(B, C, Hp, p, Wp, p)
                 .transpose(0, 2, 4, 1, 3, 5)
                 .reshape(M, K)
                 .astype(compute_dtype))
    if K_pad != K:
        patches = jnp.pad(patches, ((0, 0), (0, K_pad - K)))

    if w2d is None:
        w2d = prepare_patch_weight(weight, use_bf16=use_bf16)
    b2d = bias.reshape(1, Cout).astype(jnp.float32)

    # ---- M tiling: row-aligned, >=2 parallel blocks when M allows (v7x megacore) ---
    row_align = 16 if use_bf16 else 8
    M_min = _round_up(M, row_align)
    if M_min <= row_align:
        tm = row_align
    else:
        tm = min(512, _round_up(-(-M_min // 2), row_align))
    M_pad = _round_up(M, tm)
    if M_pad != M:
        patches = jnp.pad(patches, ((0, M_pad - M), (0, 0)))
    num_m_blocks = M_pad // tm

    flops = 2 * M_pad * K_pad * Cout

    # ---- pick collapsed-K vs K-split based on double-buffered VMEM footprint -------
    def footprint(tk):
        return 2 * (tm * tk + tk * Cout + tm * Cout) * itemsize

    collapsed = (not force_k_split) and footprint(K_pad) <= _VMEM_BUDGET_BYTES

    if collapsed:
        bytes_accessed = (patches.size * itemsize + w2d.size * itemsize
                          + Cout * 4 + M_pad * Cout * 4)
        out = pl.pallas_call(
            _patch_embed_kernel,
            grid=(num_m_blocks,),
            in_specs=[
                pl.BlockSpec((tm, K_pad), lambda i: (i, 0)),       # patch rows
                pl.BlockSpec((K_pad, Cout), lambda i: (0, 0)),     # weight slab (resident)
                pl.BlockSpec((1, Cout), lambda i: (0, 0)),         # bias
            ],
            out_specs=pl.BlockSpec((tm, Cout), lambda i: (i, 0)),
            out_shape=jax.ShapeDtypeStruct((M_pad, Cout), jnp.float32),
            compiler_params=pltpu.CompilerParams(
                dimension_semantics=("parallel",)),
            cost_estimate=pl.CostEstimate(flops=flops, transcendentals=0,
                                          bytes_accessed=bytes_accessed),
        )(patches, w2d, b2d)
    else:
        tk = 128
        for cand in (2048, 1024, 512, 256, 128):
            if K_pad % cand == 0 and footprint(cand) <= _VMEM_BUDGET_BYTES:
                tk = cand
                break
        bytes_accessed = (patches.size * itemsize
                          + w2d.size * itemsize * num_m_blocks   # weight re-DMA per M block
                          + Cout * 4 + M_pad * Cout * 4)
        out = pl.pallas_call(
            _patch_embed_kernel_ksplit,
            grid=(num_m_blocks, K_pad // tk),
            in_specs=[
                pl.BlockSpec((tm, tk), lambda i, k: (i, k)),
                pl.BlockSpec((tk, Cout), lambda i, k: (k, 0)),
                pl.BlockSpec((1, Cout), lambda i, k: (0, 0)),
            ],
            out_specs=pl.BlockSpec((tm, Cout), lambda i, k: (i, 0)),
            out_shape=jax.ShapeDtypeStruct((M_pad, Cout), jnp.float32),
            compiler_params=pltpu.CompilerParams(
                dimension_semantics=("parallel", "arbitrary")),
            cost_estimate=pl.CostEstimate(flops=flops, transcendentals=0,
                                          bytes_accessed=bytes_accessed),
        )(patches, w2d, b2d)

    return out[:M].reshape(B, NP, Cout)


def reference_forward(X, weight, bias, patch_size):
    """Pure-JAX reference: real strided conv, then flatten(2).transpose(1,2)."""
    p = patch_size
    out = jax.lax.conv_general_dilated(
        X, weight, window_strides=(p, p), padding="VALID",
        dimension_numbers=("NCHW", "OIHW", "NCHW"))
    out = out + bias[None, :, None, None]
    B, Cout = out.shape[0], out.shape[1]
    return out.reshape(B, Cout, -1).transpose(0, 2, 1)


if __name__ == "__main__":
    # Small, module-consistent shapes: num_hiddens=128, img_size=32, patch_size=8
    # (Conv2d in the module has in_channels == out_channels == num_hiddens).
    B, num_hiddens, img, p = 2, 128, 32, 8
    key = jax.random.PRNGKey(0)
    kx, kw, kb = jax.random.split(key, 3)

    X = jax.random.normal(kx, (B, num_hiddens, img, img), jnp.float32)
    fan_in = num_hiddens * p * p
    weight = jax.random.normal(kw, (num_hiddens, num_hiddens, p, p),
                               jnp.float32) / math.sqrt(fan_in)
    bias = jax.random.normal(kb, (num_hiddens,), jnp.float32) * 0.02

    num_patches = (img // p) * (img // p)
    y_ref = reference_forward(X, weight, bias, p)

    # Default path: bf16 operands (all generations), f32 accumulation, collapsed-K grid,
    # weight slab prepared once (as a model would at init).
    w2d_bf16 = prepare_patch_weight(weight, use_bf16=True)
    y = patch_embedding_forward(X, weight, bias, p, w2d=w2d_bf16)
    jax.block_until_ready(y)
    assert y.shape == (B, num_patches, num_hiddens)
    assert jnp.allclose(y, y_ref, rtol=5e-2, atol=5e-2)

    # f32-operand path (exactness check of the collapsed-K kernel).
    y_f32 = patch_embedding_forward(X, weight, bias, p, use_bf16=False)
    jax.block_until_ready(y_f32)
    assert jnp.allclose(y_f32, y_ref, rtol=1e-3, atol=1e-3)

    # K-split fallback path (exercised explicitly so the huge-K code path stays tested).
    y_ks = patch_embedding_forward(X, weight, bias, p, force_k_split=True)
    jax.block_until_ready(y_ks)
    assert jnp.allclose(y_ks, y_ref, rtol=5e-2, atol=5e-2)

    print("KERNEL_OK")
</pallas_src>

<mosaic_0001>
module attributes {stable_mosaic.version = 11 : i64} {
  func.func @_patch_embed_kernel(%arg0: i32, %arg1: memref<16x8192xbf16, #tpu.memory_space<vmem>>, %arg2: memref<8192x128xbf16, #tpu.memory_space<vmem>>, %arg3: memref<1x128xf32, #tpu.memory_space<vmem>>, %arg4: memref<16x128xf32, #tpu.memory_space<vmem>>) attributes {dimension_semantics = [#tpu.dimension_semantics<parallel>], iteration_bounds = array<i64: 2>, scalar_prefetch = 0 : i64, scratch_operands = 0 : i64, tpu.core_type = #tpu.core_type<tc>, window_params = [{transform_indices = @transform_0, window_bounds = array<i64: 16, 8192>}, {pipeline_mode = #tpu.pipeline_mode<synchronous>, transform_indices = @transform_1, window_bounds = array<i64: 8192, 128>}, {pipeline_mode = #tpu.pipeline_mode<synchronous>, transform_indices = @transform_2, window_bounds = array<i64: 1, 128>}, {transform_indices = @transform_3, window_bounds = array<i64: 16, 128>}]} {
    %c0 = arith.constant 0 : index
    %c0_0 = arith.constant 0 : index
    %0 = vector.load %arg1[%c0, %c0_0] : memref<16x8192xbf16, #tpu.memory_space<vmem>>, vector<16x8192xbf16>
    %c0_1 = arith.constant 0 : index
    %c0_2 = arith.constant 0 : index
    %1 = vector.load %arg2[%c0_1, %c0_2] : memref<8192x128xbf16, #tpu.memory_space<vmem>>, vector<8192x128xbf16>
    %cst = arith.constant dense<0.000000e+00> : vector<16x128xf32>
    %2 = tpu.matmul %0, %1, %cst {dimension_numbers = #tpu.dot_dimension_numbers<[1], [0], [0], [1], [0, 0, 1, 1], [], []>} : vector<16x8192xbf16>, vector<8192x128xbf16>, vector<16x128xf32> -> vector<16x128xf32>
    %c0_3 = arith.constant 0 : index
    %c0_4 = arith.constant 0 : index
    %3 = vector.load %arg3[%c0_3, %c0_4] : memref<1x128xf32, #tpu.memory_space<vmem>>, vector<1x128xf32>
    %4 = vector.broadcast %3 : vector<1x128xf32> to vector<16x128xf32>
    %5 = arith.addf %2, %4 : vector<16x128xf32>
    %c0_5 = arith.constant 0 : index
    %c0_6 = arith.constant 0 : index
    %6 = vector.load %arg4[%c0_5, %c0_6] : memref<16x128xf32, #tpu.memory_space<vmem>>, vector<16x128xf32>
    tpu.vector_store %arg4[%c0_5, %c0_6], %5 {strides = array<i32>} : memref<16x128xf32, #tpu.memory_space<vmem>>, vector<16x128xf32>,
    return
  }
  func.func @transform_0(%arg0: i32) -> (i32, i32) {
    %c0_i32 = arith.constant 0 : i32
    %c0_i32_0 = arith.constant 0 : i32
    return %arg0, %c0_i32 : i32, i32
  }
  func.func @transform_1(%arg0: i32) -> (i32, i32) {
    %c0_i32 = arith.constant 0 : i32
    %c0_i32_0 = arith.constant 0 : i32
    %c0_i32_1 = arith.constant 0 : i32
    return %c0_i32, %c0_i32_0 : i32, i32
  }
  func.func @transform_2(%arg0: i32) -> (i32, i32) {
    %c0_i32 = arith.constant 0 : i32
    %c0_i32_0 = arith.constant 0 : i32
    %c0_i32_1 = arith.constant 0 : i32
    return %c0_i32, %c0_i32_0 : i32, i32
  }
  func.func @transform_3(%arg0: i32) -> (i32, i32) {
    %c0_i32 = arith.constant 0 : i32
    %c0_i32_0 = arith.constant 0 : i32
    return %arg0, %c0_i32 : i32, i32
  }
}

</mosaic_0001>

<bundles_post_ra>
// kernel: tpu_custom_call.1
= control target key start
LH: loop header
LB: loop body
LE: loop exit
PB: predicated region body
PF: predicated region fallthrough
CT: control target
= control target key end

     0   :  { %8 = vsyncpa [#allocation3], 0  ;;  %s8553_s0 = inlined_call_operand.hbm [shape: bf16[32,8192], index: 0, kind: input, shape index: {}]   ;;  %s8554_s1 = inlined_call_operand.hbm [shape: bf16[8192,128], index: 1, kind: input, shape index: {}]   ;;  %s8555_s2 = inlined_call_operand.hbm [shape: f32[1,128], index: 2, kind: input, shape index: {}]   ;;  %s8556_s3 = inlined_call_operand.hbm [shape: f32[32,128], index: 3, kind: output, shape index: {}]  }
   0x1   :  { %10 = vsyncpa [#allocation3 + $0x1], 0 }
   0x2   :  { %11 = vsyncpa [#allocation6], 0 }
   0x3   :  { %12 = vsyncpa [#allocation4], 0 }
   0x4   :  { %14 = vsyncpa [#allocation4 + $0x1], 0  ;;  %s8203_s12 = smov 0   ;;  %s8205_s13 = smov 0  }
   0x5   :  { %s8207_s14 = smov 0   ;;  %s8209_s15 = smov 0  }
   0x6 LB: > { %s8224_s16 = sadd.s32 4294967295, %s8171_s15   ;;  %s6127_s17 = sadd.s32 4294967294, %s8171_s15   ;;  %s8171_s15 = sphi %s8209_s15, %s8576_s15   ;;  %s8167_s14 = sphi %s8207_s14, %s8575_s14   ;;  %s8163_s13 = sphi %s8205_s13, %s8574_s13   ;;  %s8159_s12 = sphi %s8203_s12, %s8573_s12  }
   0x7   : > { %p40_p0 = scmp.ne.s32.totalorder %s8163_s13, %s8159_s12  ;;  %p8557_p1 = scmp.eq.s32.totalorder %s8224_s16, 0 }
   0x8   : > { %p112_p3 = scmp.eq.s32.totalorder %s6127_s17, 1  ;;  %p6128_p5 = scmp.ge.s32.totalorder %s8171_s15, 1 }
   0x9   : > { %p8233_p4 = por %p8557_p1, %p40_p0  ;;  %p119_p7 = scmp.lt.s32.totalorder %s8171_s15, 3 }
   0xa   : > { %p8238_p6 = por %p112_p3, %p40_p0  ;;  %s8173_s21 = smov [#allocation5]  }
   0xb   : > { %s8560_s18 = scalar_select %p8233_p4, 1, 0 }
   0xc   : > { %s8561_s19 = scalar_select %p8238_p6, 1, 0 }
   0xd   : > { %p8243_p8 = pnand %p6128_p5, %p119_p7  ;;  %s131_s22 = sshll.u32 %s8173_s21, 4  ;;  %s8247_s22 = int_to_ptr.vmem [resolvable:$true] %s131_s22 }
   0xe   : > { %s8174_s24 = smov [#allocation7]   ;;  %s8015_s28 = scalar_lea.hbm %s8554_s1, 65536 }
   0xf   : > { %p7442_p9 = pneg %p8243_p8  ;;  %s145_s25 = sshll.u32 %s8174_s24, 4  ;;  %s8258_s25 = int_to_ptr.vmem [resolvable:$true] %s145_s25 }
  0x10   : > { %p8016_p12 = scmp.ne.s32.totalorder %s8554_s1, %s8015_s28  ;;  %p8022_p5 = scmp.lt.u32.totalorder %s8015_s28, %s8554_s1 }
  0x11   : > { %p8254_p11 = pnand %p7442_p9, %p8557_p1 }
  0x13   : > { %p8017_p13 = pneg %p8254_p11 }
  0x15   : > { %p8018_p0 = pnand %p8017_p13, %p8016_p12 }
  0x17   : > { %p8019_p3 = pneg %p8018_p0 }
  0x19   : > { %p8024_p7 = pnand %p8022_p5, %p8019_p3 }
  0x1b   : > { %8027 = shalt.err (!%p8024_p7)
}
  0x1c   : > { %s8028_s6 = scalar_lea.vmem %s8247_s22, 65536  ;;  %p8036_p2 = scmp.lt.s32.totalorder %s8247_s22, %s8247_s22 }
  0x1d   : > { %p8029_p9 = scmp.ne.s32.totalorder %s8247_s22, %s8028_s6  ;;  %p8037_p12 = scmp.lt.s32.totalorder %s8028_s6, %s8028_s6 }
  0x1f   : > { %p8031_p10 = pnand %p8029_p9, %p8017_p13  ;;  %p8038_p0 = por %p8037_p12, %p8036_p2 }
  0x21   : > { %p8032_p1 = pneg %p8031_p10 }
  0x23   : > { %p8039_p6 = pnand %p8038_p0, %p8032_p1 }
  0x25   : > { %8042 = shalt.err (!%p8039_p6)
}
  0x26   : > { %s8175_s7 = smov 64   ;;  %s8176_s8 = smov 4  }
  0x27   : > { %7445 = dma.hbm_to_vmem [thread:$0]  (!%p8254_p11), %s8554_s1, 65536, %s8247_s22, [#allocation6], %s8175_s7, %s8175_s7, %s8176_s8  }
  0x28   : > { %s8043_s21 = scalar_lea.hbm %s8555_s2, 16 }
  0x29   : > { %p8044_p2 = scmp.ne.s32.totalorder %s8555_s2, %s8043_s21  ;;  %p8050_p10 = scmp.lt.u32.totalorder %s8043_s21, %s8555_s2 }
  0x2b   : > { %p8046_p1 = pnand %p8044_p2, %p8017_p13 }
  0x2d   : > { %p8047_p6 = pneg %p8046_p1 }
  0x2f   : > { %p8052_p3 = pnand %p8050_p10, %p8047_p6 }
  0x31   : > { %8055 = shalt.err (!%p8052_p3)
}
  0x32   : > { %s8056_s22 = scalar_lea.vmem %s8258_s25, 16  ;;  %s8063_s29 = scalar_lea.vmem %s8258_s25, 32 }
  0x33   : > { %p8057_p5 = scmp.ne.s32.totalorder %s8258_s25, %s8056_s22  ;;  %p8064_p12 = scmp.lt.s32.totalorder %s8258_s25, %s8258_s25 }
  0x34   : > { %p8065_p0 = scmp.lt.s32.totalorder %s8063_s29, %s8056_s22 }
  0x35   : > { %p8059_p7 = pnand %p8057_p5, %p8017_p13 }
  0x36   : > { %p8066_p2 = por %p8065_p0, %p8064_p12 }
  0x37   : > { %p8060_p9 = pneg %p8059_p7 }
  0x39   : > { %p8067_p1 = pnand %p8066_p2, %p8060_p9 }
  0x3b   : > { %8070 = shalt.err (!%p8067_p1)
}
  0x3c   : > { %7448 = dma.hbm_to_vmem [thread:$0]  (!%p8254_p11), %s8555_s2, 16, %s8258_s25, [#allocation6]  }
  0x3d   : > { %s8314_s5 = sadd.s32 1, %s8171_s15   ;;  %s27_s23 = sadd.s32 1, %s8167_s14 }
  0x3e   : > { %s24_s6 = ssub.s32 %s8171_s15, %s8314_s5  ;;  %p34_p13 = scmp.ne.s32.totalorder %s8167_s14, %s8163_s13 }
  0x3f   : > { %p25_p6 = scmp.eq.s32.totalorder %s24_s6, 0  ;;  %p35_p10 = scmp.eq.s32.totalorder %s8171_s15, 0 }
  0x40   : > { %p8564_p3 = scmp.eq.s32.totalorder %s8224_s16, 1  ;;  %p7459_p7 = scmp.lt.s32.totalorder %s8171_s15, 2 }
  0x41   : > { %s8330_s8 = scalar_select %p25_p6, %s8167_s14, %s27_s23  }
  0x42   : > { %p8324_p5 = por %p8564_p3, %p34_p13  ;;  %p36_p9 = por %p35_p10, %p34_p13 }
  0x43   : > { %s156_s9 = sand.u32 1, %s8167_s14   ;;  %s6724_s25 = sshll.u32 %s8171_s15, 13 }
  0x44   : > { %s8565_s7 = scalar_select %p8324_p5, 1, 0 }
  0x45   : > { %s6132_s10 = sshll.u32 %s156_s9, 9  ;;  %s8337_s21 = scalar_lea.hbm %s8553_s0, %s6724_s25 }
  0x46   : > { %s160_s24 = scalar_lea.vmem [#allocation2], %s6132_s10  ;;  %p8341_p11 = pnand %p7459_p7, %p36_p9 }
  0x47   : > { %s168_s26 = sshll.u32 %s160_s24, 4  ;;  %s8345_s28 = scalar_lea.sflag [#allocation3], %s156_s9  ;;  %s8339_s26 = int_to_ptr.vmem [resolvable:$true] %s168_s26 }
  0x48   : > { %s8071_s22 = scalar_lea.hbm %s8337_s21, 8192  ;;  %p8073_p0 = pneg %p8341_p11 }
  0x49   : > { %p8072_p12 = scmp.ne.s32.totalorder %s8337_s21, %s8071_s22  ;;  %s8076_s4 = scalar_lea.hbm %s8553_s0, 16384 }
  0x4a   : > { %p8077_p13 = scmp.lt.u32.totalorder %s8337_s21, %s8553_s0  ;;  %p8078_p6 = scmp.lt.u32.totalorder %s8076_s4, %s8071_s22 }
  0x4b   : > { %p8074_p2 = pnand %p8073_p0, %p8072_p12  ;;  %p8080_p3 = scmp.lt.u32.totalorder %s8071_s22, %s8337_s21 }
  0x4c   : > { %p8079_p10 = por %p8078_p6, %p8077_p13 }
  0x4d   : > { %p8075_p1 = pneg %p8074_p2 }
  0x4e   : > { %p8081_p7 = por %p8080_p3, %p8079_p10 }
  0x50   : > { %p8082_p9 = pnand %p8081_p7, %p8075_p1 }
  0x52   : > { %8085 = shalt.err (!%p8082_p9)
}
  0x53   : > { %s8086_s9 = scalar_lea.vmem %s8339_s26, 8192  ;;  %s8177_s10 = smov [#allocation2]  }
  0x54   : > { %p8087_p12 = scmp.ne.s32.totalorder %s8339_s26, %s8086_s9  ;;  %s8091_s25 = sshll.u32 %s8177_s10, 4  ;;  %s8092_s25 = int_to_ptr.vmem [resolvable:$false] %s8091_s25 }
  0x55   : > { %s8093_s11 = scalar_lea.vmem %s8092_s25, 16384  ;;  %p8094_p4 = scmp.lt.s32.totalorder %s8339_s26, %s8092_s25 }
  0x56   : > { %p8089_p2 = pnand %p8087_p12, %p8073_p0  ;;  %p8095_p13 = scmp.lt.s32.totalorder %s8093_s11, %s8086_s9 }
  0x58   : > { %p8090_p5 = pneg %p8089_p2  ;;  %p8096_p6 = por %p8095_p13, %p8094_p4 }
  0x5a   : > { %p8097_p10 = pnand %p8096_p6, %p8090_p5 }
  0x5c   : > { %8100 = shalt.err (!%p8097_p10)
}
  0x5d   : > { %s8178_s17 = smov 4096   ;;  %s8179_s24 = smov 256  }
  0x5e   : > { %7452 = dma.hbm_to_vmem [thread:$0]  (!%p8341_p11), %s8337_s21, 8192, %s8339_s26, %s8345_s28, %s8178_s17, %s8178_s17, %s8179_s24  }
  0x5f   : > { %180 = sbr.rel (%p8243_p8) target bundleno = 856 (0x358), region = 32  ;;  %s8376_s22 = sand.u32 (!%p8243_p8), 1, %s8163_s13  }
  0x60   : > { %s6137_s29 = sshll.u32 (!%p8243_p8), %s8376_s22, 9  ;;  %s183_s30 = scalar_lea.sflag (!%p8243_p8), [#allocation3], %s8376_s22 }
  0x61   : > { %s8380_s4 = scalar_lea.vmem (!%p8243_p8), [#allocation2], %s6137_s29  ;;  %p8567_p4 = scmp.ne.s32.totalorder (!%p8243_p8), %s8560_s18, 0 }
  0x66   : > { %8146 = dma.done.wait (%p8567_p4), %s183_s30, 8192  }
  0x67   : > { %8148 = vsyncadd (%p8567_p4), %s183_s30, 4294959104  ;;  %p8568_p5 = scmp.eq.s32.totalorder %s8224_s16, 0 }
  0x69   : > { %8150 = dma.done.wait (%p8568_p5), [#allocation6], 65552   ;;  %p8569_p8 = pmov %p8568_p5 }
  0x6a   : > { %v7503_v0 = vld [vmem:[#allocation5 + $0x40] sm:$0xff]   ;;  %v7507_v4 = vld [vmem:[#allocation5 + $0x48] sm:$0xff]   ;;  %v7511_v8 = vld [vmem:[#allocation5 + $0x50] sm:$0xff]   ;;  %s6140_s18 = sshll.u32 %s8376_s22, 4  ;;  %s6725_s26 = sshll.u32 %s8224_s16, 8 }
  0x6b   : > { %8152 = vsyncadd (%p8569_p8), [#allocation6], 4294901744  ;;  %v7504_v1 = vld [vmem:[#allocation5 + $0xc0] sm:$0xff]   ;;  %6726 = vmatprep.subr.bf16.mxu0 %v7503_v0  ;;  %v7508_v5 = vld [vmem:[#allocation5 + $0xc8] sm:$0xff]   ;;  %s216_s20 = scalar_lea.vmem [#allocation8], %s6140_s18  ;;  %s8509_s23 = scalar_lea.hbm %s8556_s3, %s6725_s26 }
  0x6c   : > { %v7505_v2 = vld [vmem:[#allocation5] sm:$0xff]   ;;  %6748 = vmatprep.subr.bf16.mxu1 %v7504_v1  ;;  %v7509_v6 = vld [vmem:[#allocation5 + $0x8] sm:$0xff]   ;;  %v7512_v9 = vld [vmem:[#allocation5 + $0xd0] sm:$0xff]   ;;  %s6035_s21 = sshll.u32 %s216_s20, 4  ;;  %s6022_s6 = scalar_lea.sflag [#allocation4], %s8376_s22  ;;  %s8504_s21 = int_to_ptr.vmem [resolvable:$true] %s6035_s21 }
  0x6d   : > { %v7506_v3 = vld [vmem:[#allocation5 + $0x80] sm:$0xff]   ;;  %6727 = vmatpush3.bf16.msra.mxu0 %v7505_v2  ;;  %v7510_v7 = vld [vmem:[#allocation5 + $0x88] sm:$0xff]   ;;  %v7513_v10 = vld [vmem:[#allocation5 + $0x10] sm:$0xff]   ;;  %s8101_s9 = scalar_lea.vmem %s8504_s21, 256  ;;  %p8570_p0 = scmp.ne.s32.totalorder %s8565_s7, 0 }
  0x6e   : > { %6749 = vmatpush3.bf16.msra.mxu1 %v7506_v3  ;;  %6728 = vmatprep.subr.bf16.mxu0 %v7507_v4  ;;  %v7514_v11 = vld [vmem:[#allocation5 + $0x90] sm:$0xff]   ;;  %v7515_v12 = vld [vmem:[#allocation5 + $0x58] sm:$0xff]   ;;  %v7519_v16 = vld [vmem:[#allocation5 + $0x60] sm:$0xff]   ;;  %p8102_p11 = scmp.ne.s32.totalorder %s8504_s21, %s8101_s9  ;;  %s8180_s16 = smov [#allocation8]  }
  0x6f   : > { %6750 = vmatprep.subr.bf16.mxu1 %v7508_v5  ;;  %v7516_v13 = vld [vmem:[#allocation5 + $0xd8] sm:$0xff]   ;;  %v7520_v17 = vld [vmem:[#allocation5 + $0xe0] sm:$0xff]   ;;  %v7523_v20 = vld [vmem:[#allocation5 + $0x68] sm:$0xff]   ;;  %s8105_s10 = sshll.u32 %s8180_s16, 4  ;;  %s8106_s10 = int_to_ptr.vmem [resolvable:$false] %s8105_s10 }
  0x70   : > { %v7517_v14 = vld [vmem:[#allocation5 + $0x18] sm:$0xff]   ;;  %v7521_v18 = vld [vmem:[#allocation5 + $0x20] sm:$0xff]   ;;  %v7524_v21 = vld [vmem:[#allocation5 + $0xe8] sm:$0xff]   ;;  %p8103_p1 = pnand %p8102_p11, %p8570_p0  ;;  %s8107_s25 = scalar_lea.vmem %s8106_s10, 512 }
  0x71   : > { %6729 = vmatpush3.bf16.msra.mxu0 %v7509_v6  ;;  %v7518_v15 = vld [vmem:[#allocation5 + $0x98] sm:$0xff]   ;;  %v7522_v19 = vld [vmem:[#allocation5 + $0xa0] sm:$0xff]   ;;  %v7525_v22 = vld [vmem:[#allocation5 + $0x28] sm:$0xff]   ;;  %p8108_p7 = scmp.lt.s32.totalorder %s8504_s21, %s8106_s10  ;;  %p8109_p9 = scmp.lt.s32.totalorder %s8107_s25, %s8101_s9 }
  0x72   : > { %6751 = vmatpush3.bf16.msra.mxu1 %v7510_v7  ;;  %6730 = vmatprep.subr.bf16.mxu0 %v7511_v8  ;;  %v7526_v23 = vld [vmem:[#allocation5 + $0xa8] sm:$0xff]   ;;  %v7527_v24 = vld [vmem:[#allocation5 + $0x70] sm:$0xff]   ;;  %v7531_v28 = vld [vmem:[#allocation5 + $0x78] sm:$0xff]   ;;  %p8104_p3 = pneg %p8103_p1 }
  0x73   : > { %6752 = vmatprep.subr.bf16.mxu1 %v7512_v9  ;;  %v7528_v25 = vld [vmem:[#allocation5 + $0xf0] sm:$0xff]   ;;  %v7532_v29 = vld [vmem:[#allocation5 + $0xf8] sm:$0xff]   ;;  %v220_v32 = vld [vmem:[%s8380_s4] sm:$0xff]  ;;  %p8110_p12 = por %p8109_p9, %p8108_p7 }
  0x74   : > { %v7529_v26 = vld [vmem:[#allocation5 + $0x30] sm:$0xff]   ;;  %v7533_v30 = vld [vmem:[#allocation5 + $0x38] sm:$0xff]   ;;  %v252_v33 = vld [vmem:[%s8380_s4 + $0x100] sm:$0xff] }
  0x75   : > { %6731 = vmatpush3.bf16.msra.mxu0 %v7513_v10  ;;  %v7530_v27 = vld [vmem:[#allocation5 + $0xb0] sm:$0xff]   ;;  %v7534_v31 = vld [vmem:[#allocation5 + $0xb8] sm:$0xff]   ;;  %v221_v34 = vld [vmem:[%s8380_s4 + $0x8] sm:$0xff]  ;;  %v6142_v35 = vcombine.low %v220_v32, %v252_v33  ;;  %v6143_v36 = vcombine.high %v220_v32, %v252_v33  ;;  %p8111_p2 = pnand %p8110_p12, %p8104_p3 }
  0x76   : > { %6753 = vmatpush3.bf16.msra.mxu1 %v7514_v11  ;;  %6732 = vmatprep.subr.bf16.mxu0 %v7515_v12  ;;  %v253_v37 = vld [vmem:[%s8380_s4 + $0x108] sm:$0xff]  ;;  %v7535_v40 = vld [vmem:[#allocation5 + $0x140] sm:$0xff]   ;;  %v7543_v48 = vld [vmem:[#allocation5 + $0x150] sm:$0xff]  }
  0x77   : > { %6754 = vmatprep.subr.bf16.mxu1 %v7516_v13  ;;  %v6144_v38 = vcombine.low %v221_v34, %v253_v37  ;;  %v6145_v39 = vcombine.high %v221_v34, %v253_v37  ;;  %4739 = vmatprep.mubr.bf16.mxu0 %v6143_v36  ;;  %v7536_v41 = vld [vmem:[#allocation5 + $0x1c0] sm:$0xff]   ;;  %v7539_v44 = vld [vmem:[#allocation5 + $0x148] sm:$0xff]   ;;  %v7544_v49 = vld [vmem:[#allocation5 + $0x1d0] sm:$0xff]  }
  0x78   : > { %v7537_v42 = vld [vmem:[#allocation5 + $0x100] sm:$0xff]   ;;  %v7540_v45 = vld [vmem:[#allocation5 + $0x1c8] sm:$0xff]   ;;  %v7545_v50 = vld [vmem:[#allocation5 + $0x110] sm:$0xff]  }
  0x79   : > { %6733 = vmatpush3.bf16.msra.mxu0 %v7517_v14  ;;  %4780 = vmatprep.mubr.bf16.mxu1 %v6145_v39  ;;  %v7538_v43 = vld [vmem:[#allocation5 + $0x180] sm:$0xff]   ;;  %v7541_v46 = vld [vmem:[#allocation5 + $0x108] sm:$0xff]   ;;  %v7546_v51 = vld [vmem:[#allocation5 + $0x190] sm:$0xff]  }
  0x7a   : > { %6755 = vmatpush3.bf16.msra.mxu1 %v7518_v15  ;;  %6734 = vmatprep.subr.bf16.mxu0 %v7519_v16  ;;  %v7542_v47 = vld [vmem:[#allocation5 + $0x188] sm:$0xff]   ;;  %v7547_v52 = vld [vmem:[#allocation5 + $0x158] sm:$0xff]   ;;  %v7551_v56 = vld [vmem:[#allocation5 + $0x160] sm:$0xff]  }
  0x7b   : > { %6756 = vmatprep.subr.bf16.mxu1 %v7520_v17  ;;  %v7548_v53 = vld [vmem:[#allocation5 + $0x1d8] sm:$0xff]   ;;  %v7552_v57 = vld [vmem:[#allocation5 + $0x1e0] sm:$0xff]   ;;  %v7555_v60 = vld [vmem:[#allocation5 + $0x168] sm:$0xff]  }
  0x7c   : > { %v7549_v54 = vld [vmem:[#allocation5 + $0x118] sm:$0xff]   ;;  %v7553_v58 = vld [vmem:[#allocation5 + $0x120] sm:$0xff]   ;;  %v7556_v61 = vld [vmem:[#allocation5 + $0x1e8] sm:$0xff]  }
  0x7d   : > { %6735 = vmatpush3.bf16.msra.mxu0 %v7521_v18  ;;  %v7550_v55 = vld [vmem:[#allocation5 + $0x198] sm:$0xff]   ;;  %v7554_v59 = vld [vmem:[#allocation5 + $0x1a0] sm:$0xff]   ;;  %v7557_v62 = vld [vmem:[#allocation5 + $0x128] sm:$0xff]  }
  0x7e   : > { %6757 = vmatpush3.bf16.msra.mxu1 %v7522_v19  ;;  %6736 = vmatprep.subr.bf16.mxu0 %v7523_v20  ;;  %v7558_v63 = vld [vmem:[#allocation5 + $0x1a8] sm:$0xff]   ;;  %v7559_v0 = vld [vmem:[#allocation5 + $0x170] sm:$0xff]   ;;  %v7563_v4 = vld [vmem:[#allocation5 + $0x178] sm:$0xff]  }
  0x7f   : > { %6758 = vmatprep.subr.bf16.mxu1 %v7524_v21  ;;  %v7560_v1 = vld [vmem:[#allocation5 + $0x1f0] sm:$0xff]   ;;  %v7564_v5 = vld [vmem:[#allocation5 + $0x1f8] sm:$0xff]   ;;  %v7567_v16 = vld [vmem:[#allocation5 + $0x240] sm:$0xff]  }
  0x80   : > { %v7561_v2 = vld [vmem:[#allocation5 + $0x130] sm:$0xff]   ;;  %v7565_v6 = vld [vmem:[#allocation5 + $0x138] sm:$0xff]   ;;  %v7568_v17 = vld [vmem:[#allocation5 + $0x2c0] sm:$0xff]  }
  0x81   : > { %6737 = vmatpush3.bf16.msra.mxu0 %v7525_v22  ;;  %v7562_v3 = vld [vmem:[#allocation5 + $0x1b0] sm:$0xff]   ;;  %v7566_v7 = vld [vmem:[#allocation5 + $0x1b8] sm:$0xff]   ;;  %v7569_v18 = vld [vmem:[#allocation5 + $0x200] sm:$0xff]  }
  0x82   : > { %6759 = vmatpush3.bf16.msra.mxu1 %v7526_v23  ;;  %6738 = vmatprep.subr.bf16.mxu0 %v7527_v24  ;;  %v222_v8 = vld [vmem:[%s8380_s4 + $0x10] sm:$0xff]  ;;  %v223_v12 = vld [vmem:[%s8380_s4 + $0x18] sm:$0xff]  ;;  %v7570_v19 = vld [vmem:[#allocation5 + $0x280] sm:$0xff]  }
  0x83   : > { %6760 = vmatprep.subr.bf16.mxu1 %v7528_v25  ;;  %v254_v9 = vld [vmem:[%s8380_s4 + $0x110] sm:$0xff]  ;;  %v255_v13 = vld [vmem:[%s8380_s4 + $0x118] sm:$0xff]  ;;  %v7571_v20 = vld [vmem:[#allocation5 + $0x248] sm:$0xff]  }
  0x84   : > { %v6146_v10 = vcombine.low %v222_v8, %v254_v9  ;;  %v6147_v11 = vcombine.high %v222_v8, %v254_v9  ;;  %v6148_v14 = vcombine.low %v223_v12, %v255_v13  ;;  %v6149_v15 = vcombine.high %v223_v12, %v255_v13  ;;  %v7572_v21 = vld [vmem:[#allocation5 + $0x2c8] sm:$0xff]   ;;  %v7575_v24 = vld [vmem:[#allocation5 + $0x250] sm:$0xff]   ;;  %v7583_v32 = vld [vmem:[#allocation5 + $0x260] sm:$0xff]  }
  0x85   : > { %6739 = vmatpush3.bf16.msra.mxu0 %v7529_v26  ;;  %v7573_v22 = vld [vmem:[#allocation5 + $0x208] sm:$0xff]   ;;  %v7576_v25 = vld [vmem:[#allocation5 + $0x2d0] sm:$0xff]   ;;  %v7584_v33 = vld [vmem:[#allocation5 + $0x2e0] sm:$0xff]  }
  0x86   : > { %6761 = vmatpush3.bf16.msra.mxu1 %v7530_v27  ;;  %6740 = vmatprep.subr.bf16.mxu0 %v7531_v28  ;;  %v7574_v23 = vld [vmem:[#allocation5 + $0x288] sm:$0xff]   ;;  %v7577_v26 = vld [vmem:[#allocation5 + $0x210] sm:$0xff]   ;;  %v7579_v28 = vld [vmem:[#allocation5 + $0x258] sm:$0xff]  }
  0x87   : > { %6762 = vmatprep.subr.bf16.mxu1 %v7532_v29  ;;  %v7578_v27 = vld [vmem:[#allocation5 + $0x290] sm:$0xff]   ;;  %v7580_v29 = vld [vmem:[#allocation5 + $0x2d8] sm:$0xff]   ;;  %v7585_v34 = vld [vmem:[#allocation5 + $0x220] sm:$0xff]  }
  0x88   : > { %v7587_v36 = vld [vmem:[#allocation5 + $0x268] sm:$0xff]   ;;  %v7615_v8 = vld [vmem:[#allocation5 + $0x360] sm:$0xff]  }
  0x89   : > { %6741 = vmatpush3.bf16.msra.mxu0 %v7533_v30  ;;  %v7581_v30 = vld [vmem:[#allocation5 + $0x218] sm:$0xff]   ;;  %v7588_v37 = vld [vmem:[#allocation5 + $0x2e8] sm:$0xff]   ;;  %v7616_v9 = vld [vmem:[#allocation5 + $0x3e0] sm:$0xff]  }
  0x8a   : > { %6763 = vmatpush3.bf16.msra.mxu1 %v7534_v31  ;;  %6770 = vmatprep.subr.bf16.mxu0 %v7535_v40  ;;  %v7582_v31 = vld [vmem:[#allocation5 + $0x298] sm:$0xff]   ;;  %v7590_v39 = vld [vmem:[#allocation5 + $0x2a8] sm:$0xff]   ;;  %v7591_v40 = vld [vmem:[#allocation5 + $0x270] sm:$0xff]  }
  0x8b   : > { %6792 = vmatprep.subr.bf16.mxu1 %v7536_v41  ;;  %v7592_v41 = vld [vmem:[#allocation5 + $0x2f0] sm:$0xff]   ;;  %v7619_v12 = vld [vmem:[#allocation5 + $0x368] sm:$0xff]  }
  0x8c   : > { %4740 = vmatmul.mubr.bf16.vlgmr.msra.gmra.mrb[0].mxu0 %v6142_v35  ;;  %v7586_v35 = vld [vmem:[#allocation5 + $0x2a0] sm:$0xff]   ;;  %v7620_v13 = vld [vmem:[#allocation5 + $0x3e8] sm:$0xff]  }
  0x8d   : > { %4781 = vmatmul.mubr.bf16.vlgmr.msra.gmra.mrb[0].mxu1 %v6144_v38  ;;  %6771 = vmatpush3.bf16.msra.mxu0 %v7537_v42  ;;  %v7589_v38 = vld [vmem:[#allocation5 + $0x228] sm:$0xff]   ;;  %v7593_v42 = vld [vmem:[#allocation5 + $0x230] sm:$0xff]  }
  0x8e   : > { %6793 = vmatpush3.bf16.msra.mxu1 %v7538_v43  ;;  %6772 = vmatprep.subr.bf16.mxu0 %v7539_v44  ;;  %v7594_v43 = vld [vmem:[#allocation5 + $0x2b0] sm:$0xff]   ;;  %v7595_v44 = vld [vmem:[#allocation5 + $0x278] sm:$0xff]  }
  0x8f   : > { %6794 = vmatprep.subr.bf16.mxu1 %v7540_v45  ;;  %4821 = vmatprep.mubr.bf16.mxu0 %v6147_v11  ;;  %v7596_v45 = vld [vmem:[#allocation5 + $0x2f8] sm:$0xff]   ;;  %v7618_v11 = vld [vmem:[#allocation5 + $0x3a0] sm:$0xff]  }
  0x90   : > { %4862 = vmatprep.mubr.bf16.mxu1 %v6149_v15  ;;  %v7622_v15 = vld [vmem:[#allocation5 + $0x3a8] sm:$0xff]  }
  0x91   : > { %6773 = vmatpush3.bf16.msra.mxu0 %v7541_v46  ;;  %v7597_v46 = vld [vmem:[#allocation5 + $0x238] sm:$0xff]  }
  0x92   : > { %6795 = vmatpush3.bf16.msra.mxu1 %v7542_v47  ;;  %6774 = vmatprep.subr.bf16.mxu0 %v7543_v48  ;;  %v7598_v47 = vld [vmem:[#allocation5 + $0x2b8] sm:$0xff]   ;;  %v224_v48 = vld [vmem:[%s8380_s4 + $0x20] sm:$0xff] }
  0x93   : > { %6796 = vmatprep.subr.bf16.mxu1 %v7544_v49  ;;  %v256_v49 = vld [vmem:[%s8380_s4 + $0x120] sm:$0xff] }
  0x95   : > { %6775 = vmatpush3.bf16.msra.mxu0 %v7545_v50  ;;  %v225_v50 = vld [vmem:[%s8380_s4 + $0x28] sm:$0xff] }
  0x96   : > { %6797 = vmatpush3.bf16.msra.mxu1 %v7546_v51  ;;  %6776 = vmatprep.subr.bf16.mxu0 %v7547_v52  ;;  %v257_v51 = vld [vmem:[%s8380_s4 + $0x128] sm:$0xff]  ;;  %v6150_v52 = vcombine.low %v224_v48, %v256_v49 }
  0x97   : > { %6798 = vmatprep.subr.bf16.mxu1 %v7548_v53  ;;  %v6151_v53 = vcombine.high %v224_v48, %v256_v49  ;;  %v7647_v48 = vld [vmem:[#allocation5 + $0x460] sm:$0xff]  }
  0x98   : > { %v7648_v49 = vld [vmem:[#allocation5 + $0x4e0] sm:$0xff]  }
  0x99   : > { %6777 = vmatpush3.bf16.msra.mxu0 %v7549_v54  ;;  %v6152_v54 = vcombine.low %v225_v50, %v257_v51 }
  0x9a   : > { %6799 = vmatpush3.bf16.msra.mxu1 %v7550_v55  ;;  %6778 = vmatprep.subr.bf16.mxu0 %v7551_v56  ;;  %v6153_v55 = vcombine.high %v225_v50, %v257_v51  ;;  %v7599_v56 = vld [vmem:[#allocation5 + $0x340] sm:$0xff]  }
  0x9b   : > { %6800 = vmatprep.subr.bf16.mxu1 %v7552_v57  ;;  %v7600_v57 = vld [vmem:[#allocation5 + $0x3c0] sm:$0xff]  }
  0x9c   : > { %v7649_v50 = vld [vmem:[#allocation5 + $0x420] sm:$0xff]  }
  0x9d   : > { %6779 = vmatpush3.bf16.msra.mxu0 %v7553_v58  ;;  %v7601_v58 = vld [vmem:[#allocation5 + $0x300] sm:$0xff]  }
  0x9e   : > { %6801 = vmatpush3.bf16.msra.mxu1 %v7554_v59  ;;  %6780 = vmatprep.subr.bf16.mxu0 %v7555_v60  ;;  %v7602_v59 = vld [vmem:[#allocation5 + $0x380] sm:$0xff]   ;;  %v7603_v60 = vld [vmem:[#allocation5 + $0x348] sm:$0xff]  }
  0x9f   : > { %6802 = vmatprep.subr.bf16.mxu1 %v7556_v61  ;;  %v7604_v61 = vld [vmem:[#allocation5 + $0x3c8] sm:$0xff]   ;;  %v7650_v51 = vld [vmem:[#allocation5 + $0x4a0] sm:$0xff]  }
  0xa1   : > { %6781 = vmatpush3.bf16.msra.mxu0 %v7557_v62  ;;  %v7605_v62 = vld [vmem:[#allocation5 + $0x308] sm:$0xff]  }
  0xa2   : > { %6803 = vmatpush3.bf16.msra.mxu1 %v7558_v63  ;;  %6782 = vmatprep.subr.bf16.mxu0 %v7559_v0  ;;  %v7606_v63 = vld [vmem:[#allocation5 + $0x388] sm:$0xff]   ;;  %v7607_v0 = vld [vmem:[#allocation5 + $0x350] sm:$0xff]  }
  0xa3   : > { %6804 = vmatprep.subr.bf16.mxu1 %v7560_v1  ;;  %v7608_v1 = vld [vmem:[#allocation5 + $0x3d0] sm:$0xff]  }
  0xa5   : > { %6783 = vmatpush3.bf16.msra.mxu0 %v7561_v2  ;;  %v7609_v2 = vld [vmem:[#allocation5 + $0x310] sm:$0xff]  }
  0xa6   : > { %6805 = vmatpush3.bf16.msra.mxu1 %v7562_v3  ;;  %6784 = vmatprep.subr.bf16.mxu0 %v7563_v4  ;;  %v7610_v3 = vld [vmem:[#allocation5 + $0x390] sm:$0xff]   ;;  %v7611_v4 = vld [vmem:[#allocation5 + $0x358] sm:$0xff]  }
  0xa7   : > { %6806 = vmatprep.subr.bf16.mxu1 %v7564_v5  ;;  %v7612_v5 = vld [vmem:[#allocation5 + $0x3d8] sm:$0xff]  }
  0xa9   : > { %6785 = vmatpush3.bf16.msra.mxu0 %v7565_v6  ;;  %v7613_v6 = vld [vmem:[#allocation5 + $0x318] sm:$0xff]  }
  0xaa   : > { %6807 = vmatpush3.bf16.msra.mxu1 %v7566_v7  ;;  %6814 = vmatprep.subr.bf16.mxu0 %v7567_v16  ;;  %v7614_v7 = vld [vmem:[#allocation5 + $0x398] sm:$0xff]   ;;  %v7623_v16 = vld [vmem:[#allocation5 + $0x370] sm:$0xff]  }
  0xab   : > { %6836 = vmatprep.subr.bf16.mxu1 %v7568_v17  ;;  %v7624_v17 = vld [vmem:[#allocation5 + $0x3f0] sm:$0xff]  }
  0xac   : > { %4822 = vmatmul.mubr.bf16.vlgmr.msra.gmra.mrb[4].mxu0 %v6146_v10  ;;  %v7617_v10 = vld [vmem:[#allocation5 + $0x320] sm:$0xff]  }
  0xad   : > { %4863 = vmatmul.mubr.bf16.vlgmr.msra.gmra.mrb[4].mxu1 %v6148_v14  ;;  %6815 = vmatpush3.bf16.msra.mxu0 %v7569_v18  ;;  %v7621_v14 = vld [vmem:[#allocation5 + $0x328] sm:$0xff]   ;;  %v7625_v18 = vld [vmem:[#allocation5 + $0x330] sm:$0xff]  }
  0xae   : > { %6837 = vmatpush3.bf16.msra.mxu1 %v7570_v19  ;;  %6816 = vmatprep.subr.bf16.mxu0 %v7571_v20  ;;  %v7626_v19 = vld [vmem:[#allocation5 + $0x3b0] sm:$0xff]   ;;  %v7627_v20 = vld [vmem:[#allocation5 + $0x378] sm:$0xff]  }
  0xaf   : > { %6838 = vmatprep.subr.bf16.mxu1 %v7572_v21  ;;  %4903 = vmatprep.mubr.bf16.mxu0 %v6151_v53  ;;  %v7628_v21 = vld [vmem:[#allocation5 + $0x3f8] sm:$0xff]   ;;  %v7652_v53 = vld [vmem:[#allocation5 + $0x4e8] sm:$0xff]  }
  0xb0   : > { %4944 = vmatprep.mubr.bf16.mxu1 %v6153_v55  ;;  %v7654_v55 = vld [vmem:[#allocation5 + $0x4a8] sm:$0xff]  }
  0xb1   : > { %6817 = vmatpush3.bf16.msra.mxu0 %v7573_v22  ;;  %v7629_v22 = vld [vmem:[#allocation5 + $0x338] sm:$0xff]  }
  0xb2   : > { %6839 = vmatpush3.bf16.msra.mxu1 %v7574_v23  ;;  %6818 = vmatprep.subr.bf16.mxu0 %v7575_v24  ;;  %v7630_v23 = vld [vmem:[#allocation5 + $0x3b8] sm:$0xff]   ;;  %v226_v24 = vld [vmem:[%s8380_s4 + $0x30] sm:$0xff] }
  0xb3   : > { %6840 = vmatprep.subr.bf16.mxu1 %v7576_v25  ;;  %v258_v25 = vld [vmem:[%s8380_s4 + $0x130] sm:$0xff] }
  0xb5   : > { %6819 = vmatpush3.bf16.msra.mxu0 %v7577_v26  ;;  %v227_v26 = vld [vmem:[%s8380_s4 + $0x38] sm:$0xff] }
  0xb6   : > { %6841 = vmatpush3.bf16.msra.mxu1 %v7578_v27  ;;  %6820 = vmatprep.subr.bf16.mxu0 %v7579_v28  ;;  %v6154_v27 = vcombine.low %v226_v24, %v258_v25  ;;  %v6155_v28 = vcombine.high %v226_v24, %v258_v25  ;;  %v7679_v24 = vld [vmem:[#allocation5 + $0x560] sm:$0xff]  }
  0xb7   : > { %6842 = vmatprep.subr.bf16.mxu1 %v7580_v29  ;;  %v259_v29 = vld [vmem:[%s8380_s4 + $0x138] sm:$0xff]  ;;  %v7680_v25 = vld [vmem:[#allocation5 + $0x5e0] sm:$0xff]  }
  0xb9   : > { %6821 = vmatpush3.bf16.msra.mxu0 %v7581_v30  ;;  %v6156_v30 = vcombine.low %v227_v26, %v259_v29 }
  0xba   : > { %6843 = vmatpush3.bf16.msra.mxu1 %v7582_v31  ;;  %6822 = vmatprep.subr.bf16.mxu0 %v7583_v32  ;;  %v6157_v31 = vcombine.high %v227_v26, %v259_v29  ;;  %v7631_v32 = vld [vmem:[#allocation5 + $0x440] sm:$0xff]   ;;  %v7684_v29 = vld [vmem:[#allocation5 + $0x5e8] sm:$0xff]  }
  0xbb   : > { %6844 = vmatprep.subr.bf16.mxu1 %v7584_v33  ;;  %v7632_v33 = vld [vmem:[#allocation5 + $0x4c0] sm:$0xff]  }
  0xbc   : > { %v7681_v26 = vld [vmem:[#allocation5 + $0x520] sm:$0xff]  }
  0xbd   : > { %6823 = vmatpush3.bf16.msra.mxu0 %v7585_v34  ;;  %v7633_v34 = vld [vmem:[#allocation5 + $0x400] sm:$0xff]  }
  0xbe   : > { %6845 = vmatpush3.bf16.msra.mxu1 %v7586_v35  ;;  %6824 = vmatprep.subr.bf16.mxu0 %v7587_v36  ;;  %v7634_v35 = vld [vmem:[#allocation5 + $0x480] sm:$0xff]   ;;  %v7635_v36 = vld [vmem:[#allocation5 + $0x448] sm:$0xff]  }
  0xbf   : > { %6846 = vmatprep.subr.bf16.mxu1 %v7588_v37  ;;  %v7636_v37 = vld [vmem:[#allocation5 + $0x4c8] sm:$0xff]  }
  0xc1   : > { %6825 = vmatpush3.bf16.msra.mxu0 %v7589_v38  ;;  %v7637_v38 = vld [vmem:[#allocation5 + $0x408] sm:$0xff]  }
  0xc2   : > { %6847 = vmatpush3.bf16.msra.mxu1 %v7590_v39  ;;  %6826 = vmatprep.subr.bf16.mxu0 %v7591_v40  ;;  %v7638_v39 = vld [vmem:[#allocation5 + $0x488] sm:$0xff]   ;;  %v7639_v40 = vld [vmem:[#allocation5 + $0x450] sm:$0xff]  }
  0xc3   : > { %6848 = vmatprep.subr.bf16.mxu1 %v7592_v41  ;;  %v7640_v41 = vld [vmem:[#allocation5 + $0x4d0] sm:$0xff]  }
  0xc5   : > { %6827 = vmatpush3.bf16.msra.mxu0 %v7593_v42  ;;  %v7641_v42 = vld [vmem:[#allocation5 + $0x410] sm:$0xff]  }
  0xc6   : > { %6849 = vmatpush3.bf16.msra.mxu1 %v7594_v43  ;;  %6828 = vmatprep.subr.bf16.mxu0 %v7595_v44  ;;  %v7642_v43 = vld [vmem:[#allocation5 + $0x490] sm:$0xff]   ;;  %v7643_v44 = vld [vmem:[#allocation5 + $0x458] sm:$0xff]  }
  0xc7   : > { %6850 = vmatprep.subr.bf16.mxu1 %v7596_v45  ;;  %v7644_v45 = vld [vmem:[#allocation5 + $0x4d8] sm:$0xff]  }
  0xc9   : > { %6829 = vmatpush3.bf16.msra.mxu0 %v7597_v46  ;;  %v7645_v46 = vld [vmem:[#allocation5 + $0x418] sm:$0xff]  }
  0xca   : > { %6851 = vmatpush3.bf16.msra.mxu1 %v7598_v47  ;;  %6858 = vmatprep.subr.bf16.mxu0 %v7599_v56  ;;  %v7646_v47 = vld [vmem:[#allocation5 + $0x498] sm:$0xff]   ;;  %v7655_v56 = vld [vmem:[#allocation5 + $0x470] sm:$0xff]  }
  0xcb   : > { %6880 = vmatprep.subr.bf16.mxu1 %v7600_v57  ;;  %v7656_v57 = vld [vmem:[#allocation5 + $0x4f0] sm:$0xff]  }
  0xcc   : > { %4904 = vmatmul.mubr.bf16.vlgmr.msra.gmra.mrb[8].mxu0 %v6150_v52  ;;  %v7651_v52 = vld [vmem:[#allocation5 + $0x468] sm:$0xff]  }
  0xcd   : > { %4945 = vmatmul.mubr.bf16.vlgmr.msra.gmra.mrb[8].mxu1 %v6152_v54  ;;  %6859 = vmatpush3.bf16.msra.mxu0 %v7601_v58  ;;  %v7653_v54 = vld [vmem:[#allocation5 + $0x428] sm:$0xff]   ;;  %v7657_v58 = vld [vmem:[#allocation5 + $0x430] sm:$0xff]  }
  0xce   : > { %6881 = vmatpush3.bf16.msra.mxu1 %v7602_v59  ;;  %6860 = vmatprep.subr.bf16.mxu0 %v7603_v60  ;;  %v7658_v59 = vld [vmem:[#allocation5 + $0x4b0] sm:$0xff]   ;;  %v7659_v60 = vld [vmem:[#allocation5 + $0x478] sm:$0xff]  }
  0xcf   : > { %6882 = vmatprep.subr.bf16.mxu1 %v7604_v61  ;;  %4985 = vmatprep.mubr.bf16.mxu0 %v6155_v28  ;;  %v7660_v61 = vld [vmem:[#allocation5 + $0x4f8] sm:$0xff]   ;;  %v7683_v28 = vld [vmem:[#allocation5 + $0x568] sm:$0xff]  }
  0xd0   : > { %5026 = vmatprep.mubr.bf16.mxu1 %v6157_v31  ;;  %v7686_v31 = vld [vmem:[#allocation5 + $0x5a8] sm:$0xff]  }
  0xd1   : > { %6861 = vmatpush3.bf16.msra.mxu0 %v7605_v62  ;;  %v7661_v62 = vld [vmem:[#allocation5 + $0x438] sm:$0xff]  }
  0xd2   : > { %6883 = vmatpush3.bf16.msra.mxu1 %v7606_v63  ;;  %6862 = vmatprep.subr.bf16.mxu0 %v7607_v0  ;;  %v7662_v63 = vld [vmem:[#allocation5 + $0x4b8] sm:$0xff]   ;;  %v228_v0 = vld [vmem:[%s8380_s4 + $0x40] sm:$0xff] }
  0xd3   : > { %6884 = vmatprep.subr.bf16.mxu1 %v7608_v1  ;;  %v260_v1 = vld [vmem:[%s8380_s4 + $0x140] sm:$0xff] }
  0xd5   : > { %6863 = vmatpush3.bf16.msra.mxu0 %v7609_v2  ;;  %v6158_v2 = vcombine.low %v228_v0, %v260_v1 }
  0xd6   : > { %6885 = vmatpush3.bf16.msra.mxu1 %v7610_v3  ;;  %6864 = vmatprep.subr.bf16.mxu0 %v7611_v4  ;;  %v6159_v3 = vcombine.high %v228_v0, %v260_v1  ;;  %v229_v4 = vld [vmem:[%s8380_s4 + $0x48] sm:$0xff]  ;;  %v7711_v0 = vld [vmem:[#allocation5 + $0x660] sm:$0xff]  }
  0xd7   : > { %6886 = vmatprep.subr.bf16.mxu1 %v7612_v5  ;;  %v261_v5 = vld [vmem:[%s8380_s4 + $0x148] sm:$0xff]  ;;  %v7712_v1 = vld [vmem:[#allocation5 + $0x6e0] sm:$0xff]  }
  0xd9   : > { %6865 = vmatpush3.bf16.msra.mxu0 %v7613_v6  ;;  %v6160_v6 = vcombine.low %v229_v4, %v261_v5 }
  0xda   : > { %6887 = vmatpush3.bf16.msra.mxu1 %v7614_v7  ;;  %6866 = vmatprep.subr.bf16.mxu0 %v7615_v8  ;;  %v6161_v7 = vcombine.high %v229_v4, %v261_v5  ;;  %v7663_v8 = vld [vmem:[#allocation5 + $0x540] sm:$0xff]   ;;  %v7715_v4 = vld [vmem:[#allocation5 + $0x668] sm:$0xff]  }
  0xdb   : > { %6888 = vmatprep.subr.bf16.mxu1 %v7616_v9  ;;  %v7664_v9 = vld [vmem:[#allocation5 + $0x5c0] sm:$0xff]   ;;  %v7716_v5 = vld [vmem:[#allocation5 + $0x6e8] sm:$0xff]  }
  0xdd   : > { %6867 = vmatpush3.bf16.msra.mxu0 %v7617_v10  ;;  %v7665_v10 = vld [vmem:[#allocation5 + $0x500] sm:$0xff]  }
  0xde   : > { %6889 = vmatpush3.bf16.msra.mxu1 %v7618_v11  ;;  %6868 = vmatprep.subr.bf16.mxu0 %v7619_v12  ;;  %v7666_v11 = vld [vmem:[#allocation5 + $0x580] sm:$0xff]   ;;  %v7667_v12 = vld [vmem:[#allocation5 + $0x548] sm:$0xff]  }
  0xdf   : > { %6890 = vmatprep.subr.bf16.mxu1 %v7620_v13  ;;  %v7668_v13 = vld [vmem:[#allocation5 + $0x5c8] sm:$0xff]  }
  0xe1   : > { %6869 = vmatpush3.bf16.msra.mxu0 %v7621_v14  ;;  %v7669_v14 = vld [vmem:[#allocation5 + $0x508] sm:$0xff]  }
  0xe2   : > { %6891 = vmatpush3.bf16.msra.mxu1 %v7622_v15  ;;  %6870 = vmatprep.subr.bf16.mxu0 %v7623_v16  ;;  %v7670_v15 = vld [vmem:[#allocation5 + $0x588] sm:$0xff]   ;;  %v7671_v16 = vld [vmem:[#allocation5 + $0x550] sm:$0xff]  }
  0xe3   : > { %6892 = vmatprep.subr.bf16.mxu1 %v7624_v17  ;;  %v7672_v17 = vld [vmem:[#allocation5 + $0x5d0] sm:$0xff]  }
  0xe5   : > { %6871 = vmatpush3.bf16.msra.mxu0 %v7625_v18  ;;  %v7673_v18 = vld [vmem:[#allocation5 + $0x510] sm:$0xff]  }
  0xe6   : > { %6893 = vmatpush3.bf16.msra.mxu1 %v7626_v19  ;;  %6872 = vmatprep.subr.bf16.mxu0 %v7627_v20  ;;  %v7674_v19 = vld [vmem:[#allocation5 + $0x590] sm:$0xff]   ;;  %v7675_v20 = vld [vmem:[#allocation5 + $0x558] sm:$0xff]  }
  0xe7   : > { %6894 = vmatprep.subr.bf16.mxu1 %v7628_v21  ;;  %v7676_v21 = vld [vmem:[#allocation5 + $0x5d8] sm:$0xff]  }
  0xe9   : > { %6873 = vmatpush3.bf16.msra.mxu0 %v7629_v22  ;;  %v7677_v22 = vld [vmem:[#allocation5 + $0x518] sm:$0xff]  }
  0xea   : > { %6895 = vmatpush3.bf16.msra.mxu1 %v7630_v23  ;;  %6902 = vmatprep.subr.bf16.mxu0 %v7631_v32  ;;  %v7678_v23 = vld [vmem:[#allocation5 + $0x598] sm:$0xff]   ;;  %v7687_v32 = vld [vmem:[#allocation5 + $0x570] sm:$0xff]  }
  0xeb   : > { %6924 = vmatprep.subr.bf16.mxu1 %v7632_v33  ;;  %v7688_v33 = vld [vmem:[#allocation5 + $0x5f0] sm:$0xff]  }
  0xec   : > { %4986 = vmatmul.mubr.bf16.vlgmr.msra.gmra.mrb[12].mxu0 %v6154_v27  ;;  %v7682_v27 = vld [vmem:[#allocation5 + $0x5a0] sm:$0xff]  }
  0xed   : > { %5027 = vmatmul.mubr.bf16.vlgmr.msra.gmra.mrb[12].mxu1 %v6156_v30  ;;  %6903 = vmatpush3.bf16.msra.mxu0 %v7633_v34  ;;  %v7685_v30 = vld [vmem:[#allocation5 + $0x528] sm:$0xff]   ;;  %v7689_v34 = vld [vmem:[#allocation5 + $0x530] sm:$0xff]  }
  0xee   : > { %6925 = vmatpush3.bf16.msra.mxu1 %v7634_v35  ;;  %6904 = vmatprep.subr.bf16.mxu0 %v7635_v36  ;;  %v7690_v35 = vld [vmem:[#allocation5 + $0x5b0] sm:$0xff]   ;;  %v7691_v36 = vld [vmem:[#allocation5 + $0x578] sm:$0xff]  }
  0xef   : > { %6926 = vmatprep.subr.bf16.mxu1 %v7636_v37  ;;  %5067 = vmatprep.mubr.bf16.mxu0 %v6159_v3  ;;  %v7692_v37 = vld [vmem:[#allocation5 + $0x5f8] sm:$0xff]   ;;  %v7714_v3 = vld [vmem:[#allocation5 + $0x6a0] sm:$0xff]  }
  0xf0   : > { %5108 = vmatprep.mubr.bf16.mxu1 %v6161_v7  ;;  %v7718_v7 = vld [vmem:[#allocation5 + $0x6a8] sm:$0xff]  }
  0xf1   : > { %6905 = vmatpush3.bf16.msra.mxu0 %v7637_v38  ;;  %v7693_v38 = vld [vmem:[#allocation5 + $0x538] sm:$0xff]  }
  0xf2   : > { %6927 = vmatpush3.bf16.msra.mxu1 %v7638_v39  ;;  %6906 = vmatprep.subr.bf16.mxu0 %v7639_v40  ;;  %v7694_v39 = vld [vmem:[#allocation5 + $0x5b8] sm:$0xff]   ;;  %v230_v40 = vld [vmem:[%s8380_s4 + $0x50] sm:$0xff] }
  0xf3   : > { %6928 = vmatprep.subr.bf16.mxu1 %v7640_v41  ;;  %v262_v41 = vld [vmem:[%s8380_s4 + $0x150] sm:$0xff] }
  0xf5   : > { %6907 = vmatpush3.bf16.msra.mxu0 %v7641_v42  ;;  %v231_v42 = vld [vmem:[%s8380_s4 + $0x58] sm:$0xff] }
  0xf6   : > { %6929 = vmatpush3.bf16.msra.mxu1 %v7642_v43  ;;  %6908 = vmatprep.subr.bf16.mxu0 %v7643_v44  ;;  %v263_v43 = vld [vmem:[%s8380_s4 + $0x158] sm:$0xff]  ;;  %v6162_v44 = vcombine.low %v230_v40, %v262_v41 }
  0xf7   : > { %6930 = vmatprep.subr.bf16.mxu1 %v7644_v45  ;;  %v6163_v45 = vcombine.high %v230_v40, %v262_v41  ;;  %v7742_v41 = vld [vmem:[#allocation5 + $0x798] sm:$0xff]  }
  0xf9   : > { %6909 = vmatpush3.bf16.msra.mxu0 %v7645_v46  ;;  %v6164_v46 = vcombine.low %v231_v42, %v263_v43 }
  0xfa   : > { %6931 = vmatpush3.bf16.msra.mxu1 %v7646_v47  ;;  %6910 = vmatprep.subr.bf16.mxu0 %v7647_v48  ;;  %v6165_v47 = vcombine.high %v231_v42, %v263_v43  ;;  %v7695_v48 = vld [vmem:[#allocation5 + $0x640] sm:$0xff]  }
  0xfb   : > { %6932 = vmatprep.subr.bf16.mxu1 %v7648_v49  ;;  %v7696_v49 = vld [vmem:[#allocation5 + $0x6c0] sm:$0xff]  }
  0xfc   : > { %v7743_v43 = vld [vmem:[#allocation5 + $0x760] sm:$0xff]  }
  0xfd   : > { %6911 = vmatpush3.bf16.msra.mxu0 %v7649_v50  ;;  %v7697_v50 = vld [vmem:[#allocation5 + $0x600] sm:$0xff]  }
  0xfe   : > { %6933 = vmatpush3.bf16.msra.mxu1 %v7650_v51  ;;  %6912 = vmatprep.subr.bf16.mxu0 %v7651_v52  ;;  %v7698_v51 = vld [vmem:[#allocation5 + $0x680] sm:$0xff]   ;;  %v7699_v52 = vld [vmem:[#allocation5 + $0x648] sm:$0xff]  }
  0xff   : > { %6934 = vmatprep.subr.bf16.mxu1 %v7652_v53  ;;  %v7700_v53 = vld [vmem:[#allocation5 + $0x6c8] sm:$0xff]  }
 0x101   : > { %6913 = vmatpush3.bf16.msra.mxu0 %v7653_v54  ;;  %v7701_v54 = vld [vmem:[#allocation5 + $0x608] sm:$0xff]  }
 0x102   : > { %6935 = vmatpush3.bf16.msra.mxu1 %v7654_v55  ;;  %6914 = vmatprep.subr.bf16.mxu0 %v7655_v56  ;;  %v7702_v55 = vld [vmem:[#allocation5 + $0x688] sm:$0xff]   ;;  %v7703_v56 = vld [vmem:[#allocation5 + $0x650] sm:$0xff]  }
 0x103   : > { %6936 = vmatprep.subr.bf16.mxu1 %v7656_v57  ;;  %v7704_v57 = vld [vmem:[#allocation5 + $0x6d0] sm:$0xff]  }
 0x105   : > { %6915 = vmatpush3.bf16.msra.mxu0 %v7657_v58  ;;  %v7705_v58 = vld [vmem:[#allocation5 + $0x610] sm:$0xff]  }
 0x106   : > { %6937 = vmatpush3.bf16.msra.mxu1 %v7658_v59  ;;  %6916 = vmatprep.subr.bf16.mxu0 %v7659_v60  ;;  %v7706_v59 = vld [vmem:[#allocation5 + $0x690] sm:$0xff]   ;;  %v7707_v60 = vld [vmem:[#allocation5 + $0x658] sm:$0xff]  }
 0x107   : > { %6938 = vmatprep.subr.bf16.mxu1 %v7660_v61  ;;  %v7708_v61 = vld [vmem:[#allocation5 + $0x6d8] sm:$0xff]  }
 0x109   : > { %6917 = vmatpush3.bf16.msra.mxu0 %v7661_v62  ;;  %v7709_v62 = vld [vmem:[#allocation5 + $0x618] sm:$0xff]  }
 0x10a   : > { %6939 = vmatpush3.bf16.msra.mxu1 %v7662_v63  ;;  %6946 = vmatprep.subr.bf16.mxu0 %v7663_v8  ;;  %v7710_v63 = vld [vmem:[#allocation5 + $0x698] sm:$0xff]   ;;  %v7719_v8 = vld [vmem:[#allocation5 + $0x670] sm:$0xff]  }
 0x10b   : > { %6968 = vmatprep.subr.bf16.mxu1 %v7664_v9  ;;  %v7720_v9 = vld [vmem:[#allocation5 + $0x6f0] sm:$0xff]  }
 0x10c   : > { %5068 = vmatmul.mubr.bf16.vlgmr.msra.gmra.mrb[16].mxu0 %v6158_v2  ;;  %v7713_v2 = vld [vmem:[#allocation5 + $0x620] sm:$0xff]  }
 0x10d   : > { %5109 = vmatmul.mubr.bf16.vlgmr.msra.gmra.mrb[16].mxu1 %v6160_v6  ;;  %6947 = vmatpush3.bf16.msra.mxu0 %v7665_v10  ;;  %v7717_v6 = vld [vmem:[#allocation5 + $0x628] sm:$0xff]   ;;  %v7721_v10 = vld [vmem:[#allocation5 + $0x630] sm:$0xff]  }
 0x10e   : > { %6969 = vmatpush3.bf16.msra.mxu1 %v7666_v11  ;;  %6948 = vmatprep.subr.bf16.mxu0 %v7667_v12  ;;  %v7722_v11 = vld [vmem:[#allocation5 + $0x6b0] sm:$0xff]   ;;  %v7723_v12 = vld [vmem:[#allocation5 + $0x678] sm:$0xff]  }
 0x10f   : > { %6970 = vmatprep.subr.bf16.mxu1 %v7668_v13  ;;  %5149 = vmatprep.mubr.bf16.mxu0 %v6163_v45  ;;  %v7724_v13 = vld [vmem:[#allocation5 + $0x6f8] sm:$0xff]  }
 0x110   : > { %5190 = vmatprep.mubr.bf16.mxu1 %v6165_v47 }
 0x111   : > { %6949 = vmatpush3.bf16.msra.mxu0 %v7669_v14  ;;  %v7725_v14 = vld [vmem:[#allocation5 + $0x638] sm:$0xff]  }
 0x112   : > { %6971 = vmatpush3.bf16.msra.mxu1 %v7670_v15  ;;  %6950 = vmatprep.subr.bf16.mxu0 %v7671_v16  ;;  %v7726_v15 = vld [vmem:[#allocation5 + $0x6b8] sm:$0xff]   ;;  %v232_v16 = vld [vmem:[%s8380_s4 + $0x60] sm:$0xff] }
 0x113   : > { %6972 = vmatprep.subr.bf16.mxu1 %v7672_v17  ;;  %v264_v17 = vld [vmem:[%s8380_s4 + $0x160] sm:$0xff] }
 0x115   : > { %6951 = vmatpush3.bf16.msra.mxu0 %v7673_v18  ;;  %v233_v18 = vld [vmem:[%s8380_s4 + $0x68] sm:$0xff] }
 0x116   : > { %6973 = vmatpush3.bf16.msra.mxu1 %v7674_v19  ;;  %6952 = vmatprep.subr.bf16.mxu0 %v7675_v20  ;;  %v6166_v19 = vcombine.low %v232_v16, %v264_v17  ;;  %v6167_v20 = vcombine.high %v232_v16, %v264_v17  ;;  %v7759_v17 = vld [vmem:[#allocation5 + $0x840] sm:$0xff]  }
 0x117   : > { %6974 = vmatprep.subr.bf16.mxu1 %v7676_v21  ;;  %v265_v21 = vld [vmem:[%s8380_s4 + $0x168] sm:$0xff] }
 0x119   : > { %6953 = vmatpush3.bf16.msra.mxu0 %v7677_v22  ;;  %v6168_v22 = vcombine.low %v233_v18, %v265_v21 }
 0x11a   : > { %6975 = vmatpush3.bf16.msra.mxu1 %v7678_v23  ;;  %6954 = vmatprep.subr.bf16.mxu0 %v7679_v24  ;;  %v6169_v23 = vcombine.high %v233_v18, %v265_v21  ;;  %v7727_v24 = vld [vmem:[#allocation5 + $0x740] sm:$0xff]   ;;  %v7763_v21 = vld [vmem:[#allocation5 + $0x848] sm:$0xff]  }
 0x11b   : > { %6976 = vmatprep.subr.bf16.mxu1 %v7680_v25  ;;  %v7728_v25 = vld [vmem:[#allocation5 + $0x7c0] sm:$0xff]  }
 0x11c   : > { %v7760_v18 = vld [vmem:[#allocation5 + $0x8c0] sm:$0xff]  }
 0x11d   : > { %6955 = vmatpush3.bf16.msra.mxu0 %v7681_v26  ;;  %v7729_v26 = vld [vmem:[#allocation5 + $0x700] sm:$0xff]  }
 0x11e   : > { %6977 = vmatpush3.bf16.msra.mxu1 %v7682_v27  ;;  %6956 = vmatprep.subr.bf16.mxu0 %v7683_v28  ;;  %v7730_v27 = vld [vmem:[#allocation5 + $0x780] sm:$0xff]   ;;  %v7731_v28 = vld [vmem:[#allocation5 + $0x748] sm:$0xff]  }
 0x11f   : > { %6978 = vmatprep.subr.bf16.mxu1 %v7684_v29  ;;  %v7732_v29 = vld [vmem:[#allocation5 + $0x7c8] sm:$0xff]  }
 0x121   : > { %6957 = vmatpush3.bf16.msra.mxu0 %v7685_v30  ;;  %v7733_v30 = vld [vmem:[#allocation5 + $0x708] sm:$0xff]  }
 0x122   : > { %6979 = vmatpush3.bf16.msra.mxu1 %v7686_v31  ;;  %6958 = vmatprep.subr.bf16.mxu0 %v7687_v32  ;;  %v7734_v31 = vld [vmem:[#allocation5 + $0x788] sm:$0xff]   ;;  %v7735_v32 = vld [vmem:[#allocation5 + $0x750] sm:$0xff]  }
 0x123   : > { %6980 = vmatprep.subr.bf16.mxu1 %v7688_v33  ;;  %v7736_v33 = vld [vmem:[#allocation5 + $0x7d0] sm:$0xff]  }
 0x125   : > { %6959 = vmatpush3.bf16.msra.mxu0 %v7689_v34  ;;  %v7737_v34 = vld [vmem:[#allocation5 + $0x710] sm:$0xff]  }
 0x126   : > { %6981 = vmatpush3.bf16.msra.mxu1 %v7690_v35  ;;  %6960 = vmatprep.subr.bf16.mxu0 %v7691_v36  ;;  %v7738_v35 = vld [vmem:[#allocation5 + $0x790] sm:$0xff]   ;;  %v7739_v36 = vld [vmem:[#allocation5 + $0x758] sm:$0xff]  }
 0x127   : > { %6982 = vmatprep.subr.bf16.mxu1 %v7692_v37  ;;  %v7740_v37 = vld [vmem:[#allocation5 + $0x7d8] sm:$0xff]  }
 0x129   : > { %6961 = vmatpush3.bf16.msra.mxu0 %v7693_v38 }
 0x12a   : > { %6983 = vmatpush3.bf16.msra.mxu1 %v7694_v39  ;;  %6990 = vmatprep.subr.bf16.mxu0 %v7695_v48  ;;  %v7741_v39 = vld [vmem:[#allocation5 + $0x718] sm:$0xff]  }
 0x12b   : > { %7012 = vmatprep.subr.bf16.mxu1 %v7696_v49  ;;  %v7745_v49 = vld [vmem:[#allocation5 + $0x720] sm:$0xff]  }
 0x12c   : > { %5150 = vmatmul.mubr.bf16.vlgmr.msra.gmra.mrb[20].mxu0 %v6162_v44 }
 0x12d   : > { %5191 = vmatmul.mubr.bf16.vlgmr.msra.gmra.mrb[20].mxu1 %v6164_v46  ;;  %6991 = vmatpush3.bf16.msra.mxu0 %v7697_v50  ;;  %v7744_v46 = vld [vmem:[#allocation5 + $0x7e0] sm:$0xff]  }
 0x12e   : > { %7013 = vmatpush3.bf16.msra.mxu1 %v7698_v51  ;;  %6992 = vmatprep.subr.bf16.mxu0 %v7699_v52  ;;  %v7746_v51 = vld [vmem:[#allocation5 + $0x7a0] sm:$0xff]  }
 0x12f   : > { %7014 = vmatprep.subr.bf16.mxu1 %v7700_v53  ;;  %5231 = vmatprep.mubr.bf16.mxu0 %v6167_v20  ;;  %v6141_v52 = vld [vmem:[#allocation7] ss:$0 sm:$0xff] }
 0x130   : > { %5272 = vmatprep.mubr.bf16.mxu1 %v6169_v23  ;;  %v7762_v20 = vld [vmem:[#allocation5 + $0x880] sm:$0xff]   ;;  %v7765_v23 = vld [vmem:[#allocation5 + $0x808] sm:$0xff]  }
 0x131   : > { %6993 = vmatpush3.bf16.msra.mxu0 %v7701_v54 }
 0x132   : > { %7015 = vmatpush3.bf16.msra.mxu1 %v7702_v55  ;;  %6994 = vmatprep.subr.bf16.mxu0 %v7703_v56  ;;  %v7747_v55 = vld [vmem:[#allocation5 + $0x768] sm:$0xff]  }
 0x133   : > { %7016 = vmatprep.subr.bf16.mxu1 %v7704_v57 }
 0x135   : > { %6995 = vmatpush3.bf16.msra.mxu0 %v7705_v58  ;;  %v7748_v58 = vld [vmem:[#allocation5 + $0x7e8] sm:$0xff]  }
 0x136   : > { %7017 = vmatpush3.bf16.msra.mxu1 %v7706_v59  ;;  %6996 = vmatprep.subr.bf16.mxu0 %v7707_v60 }
 0x137   : > { %7018 = vmatprep.subr.bf16.mxu1 %v7708_v61  ;;  %v7749_v61 = vld [vmem:[#allocation5 + $0x728] sm:$0xff]  }
 0x139   : > { %6997 = vmatpush3.bf16.msra.mxu0 %v7709_v62 }
 0x13a   : > { %7019 = vmatpush3.bf16.msra.mxu1 %v7710_v63  ;;  %6998 = vmatprep.subr.bf16.mxu0 %v7711_v0  ;;  %v7750_v63 = vld [vmem:[#allocation5 + $0x7a8] sm:$0xff]  }
 0x13b   : > { %7020 = vmatprep.subr.bf16.mxu1 %v7712_v1  ;;  %v7751_v1 = vld [vmem:[#allocation5 + $0x770] sm:$0xff]  }
 0x13d   : > { %6999 = vmatpush3.bf16.msra.mxu0 %v7713_v2  ;;  %v7752_v2 = vld [vmem:[#allocation5 + $0x7f0] sm:$0xff]  }
 0x13e   : > { %7021 = vmatpush3.bf16.msra.mxu1 %v7714_v3  ;;  %7000 = vmatprep.subr.bf16.mxu0 %v7715_v4  ;;  %v7753_v3 = vld [vmem:[#allocation5 + $0x730] sm:$0xff]  }
 0x13f   : > { %7022 = vmatprep.subr.bf16.mxu1 %v7716_v5  ;;  %v7754_v4 = vld [vmem:[#allocation5 + $0x7b0] sm:$0xff]   ;;  %v7755_v5 = vld [vmem:[#allocation5 + $0x778] sm:$0xff]  }
 0x141   : > { %7001 = vmatpush3.bf16.msra.mxu0 %v7717_v6  ;;  %v7756_v6 = vld [vmem:[#allocation5 + $0x7f8] sm:$0xff]  }
 0x142   : > { %7023 = vmatpush3.bf16.msra.mxu1 %v7718_v7  ;;  %7002 = vmatprep.subr.bf16.mxu0 %v7719_v8  ;;  %v7757_v7 = vld [vmem:[#allocation5 + $0x738] sm:$0xff]  }
 0x143   : > { %7024 = vmatprep.subr.bf16.mxu1 %v7720_v9  ;;  %v7758_v8 = vld [vmem:[#allocation5 + $0x7b8] sm:$0xff]   ;;  %v234_v9 = vld [vmem:[%s8380_s4 + $0x70] sm:$0xff] }
 0x145   : > { %7003 = vmatpush3.bf16.msra.mxu0 %v7721_v10  ;;  %v266_v10 = vld [vmem:[%s8380_s4 + $0x170] sm:$0xff] }
 0x146   : > { %7025 = vmatpush3.bf16.msra.mxu1 %v7722_v11  ;;  %7004 = vmatprep.subr.bf16.mxu0 %v7723_v12  ;;  %v235_v11 = vld [vmem:[%s8380_s4 + $0x78] sm:$0xff] }
 0x147   : > { %7026 = vmatprep.subr.bf16.mxu1 %v7724_v13  ;;  %v267_v12 = vld [vmem:[%s8380_s4 + $0x178] sm:$0xff]  ;;  %v6170_v13 = vcombine.low %v234_v9, %v266_v10 }
 0x148   : > { %v6173_v16 = vcombine.high %v235_v11, %v267_v12 }
 0x149   : > { %7005 = vmatpush3.bf16.msra.mxu0 %v7725_v14  ;;  %v6171_v14 = vcombine.high %v234_v9, %v266_v10  ;;  %v7791_v9 = vld [vmem:[#allocation5 + $0x940] sm:$0xff]  }
 0x14a   : > { %7027 = vmatpush3.bf16.msra.mxu1 %v7726_v15  ;;  %7034 = vmatprep.subr.bf16.mxu0 %v7727_v24  ;;  %v6172_v15 = vcombine.low %v235_v11, %v267_v12  ;;  %v7766_v24 = vld [vmem:[#allocation5 + $0x888] sm:$0xff]   ;;  %v7792_v10 = vld [vmem:[#allocation5 + $0x9c0] sm:$0xff]  }
 0x14b   : > { %7056 = vmatprep.subr.bf16.mxu1 %v7728_v25  ;;  %v7767_v25 = vld [vmem:[#allocation5 + $0x850] sm:$0xff]   ;;  %v7793_v11 = vld [vmem:[#allocation5 + $0x900] sm:$0xff]  }
 0x14c   : > { %5232 = vmatmul.mubr.bf16.vlgmr.msra.gmra.mrb[24].mxu0 %v6166_v19  ;;  %v7761_v19 = vld [vmem:[#allocation5 + $0x800] sm:$0xff]  }
 0x14d   : > { %5273 = vmatmul.mubr.bf16.vlgmr.msra.gmra.mrb[24].mxu1 %v6168_v22  ;;  %7035 = vmatpush3.bf16.msra.mxu0 %v7729_v26  ;;  %v7764_v22 = vld [vmem:[#allocation5 + $0x8c8] sm:$0xff]   ;;  %v7768_v26 = vld [vmem:[#allocation5 + $0x8d0] sm:$0xff]   ;;  %v7794_v12 = vld [vmem:[#allocation5 + $0x980] sm:$0xff]  }
 0x14e   : > { %7057 = vmatpush3.bf16.msra.mxu1 %v7730_v27  ;;  %7036 = vmatprep.subr.bf16.mxu0 %v7731_v28  ;;  %v7769_v27 = vld [vmem:[#allocation5 + $0x810] sm:$0xff]  }
 0x14f   : > { %7058 = vmatprep.subr.bf16.mxu1 %v7732_v29  ;;  %5313 = vmatprep.mubr.bf16.mxu0 %v6171_v14  ;;  %v7770_v28 = vld [vmem:[#allocation5 + $0x890] sm:$0xff]   ;;  %v7771_v29 = vld [vmem:[#allocation5 + $0x858] sm:$0xff]   ;;  %v7796_v14 = vld [vmem:[#allocation5 + $0x9c8] sm:$0xff]  }
 0x150   : > { %5354 = vmatprep.mubr.bf16.mxu1 %v6173_v16  ;;  %v7798_v16 = vld [vmem:[#allocation5 + $0x988] sm:$0xff]  }
 0x151   : > { %7037 = vmatpush3.bf16.msra.mxu0 %v7733_v30  ;;  %v7772_v30 = vld [vmem:[#allocation5 + $0x8d8] sm:$0xff]  }
 0x152   : > { %7059 = vmatpush3.bf16.msra.mxu1 %v7734_v31  ;;  %7038 = vmatprep.subr.bf16.mxu0 %v7735_v32  ;;  %v7773_v32 = vld [vmem:[#allocation5 + $0x818] sm:$0xff]  }
 0x153   : > { %7060 = vmatprep.subr.bf16.mxu1 %v7736_v33 }
 0x155   : > { %7039 = vmatpush3.bf16.msra.mxu0 %v7737_v34  ;;  %v7774_v34 = vld [vmem:[#allocation5 + $0x898] sm:$0xff]  }
 0x156   : > { %7061 = vmatpush3.bf16.msra.mxu1 %v7738_v35  ;;  %7040 = vmatprep.subr.bf16.mxu0 %v7739_v36  ;;  %v7775_v36 = vld [vmem:[#allocation5 + $0x860] sm:$0xff]  }
 0x157   : > { %7062 = vmatprep.subr.bf16.mxu1 %v7740_v37 }
 0x159   : > { %7041 = vmatpush3.bf16.msra.mxu0 %v7741_v39  ;;  %v7776_v39 = vld [vmem:[#allocation5 + $0x8e0] sm:$0xff]  }
 0x15a   : > { %7063 = vmatpush3.bf16.msra.mxu1 %v7742_v41  ;;  %7042 = vmatprep.subr.bf16.mxu0 %v7743_v43 }
 0x15b   : > { %7064 = vmatprep.subr.bf16.mxu1 %v7744_v46 }
 0x15d   : > { %7043 = vmatpush3.bf16.msra.mxu0 %v7745_v49 }
 0x15e   : > { %7065 = vmatpush3.bf16.msra.mxu1 %v7746_v51  ;;  %7044 = vmatprep.subr.bf16.mxu0 %v7747_v55  ;;  %v7780_v51 = vld [vmem:[#allocation5 + $0x8e8] sm:$0xff]  }
 0x15f   : > { %v6742_v38 = vpop.f32.mrb[0].mxu0  ;;  %7066 = vmatprep.subr.bf16.mxu1 %v7748_v58  ;;  %v7782_v55 = vld [vmem:[#allocation5 + $0x8a8] sm:$0xff]   ;;  %v7784_v58 = vld [vmem:[#allocation5 + $0x8f0] sm:$0xff]  }
 0x160   : > { %v6764_v40 = vpop.f32.mrb[0].mxu1  ;;  %v6743_v42 = vpop.f32.mrb[1].mxu0 }
 0x161   : > { %v6744_v44 = vadd.f32 %v6743_v42, %v6742_v38  ;;  %v6765_v45 = vpop.f32.mrb[1].mxu1  ;;  %v6745_v48 = vpop.f32.mrb[2].mxu0  ;;  %7045 = vmatpush3.bf16.msra.mxu0 %v7749_v61  ;;  %v7777_v42 = vld [vmem:[#allocation5 + $0x820] sm:$0xff]   ;;  %v7787_v61 = vld [vmem:[#allocation5 + $0x878] sm:$0xff]  }
 0x162   : > { %v6766_v47 = vadd.f32 %v6765_v45, %v6764_v40  ;;  %v6767_v50 = vpop.f32.mrb[2].mxu1  ;;  %v6746_v53 = vpop.f32.mrb[3].mxu0  ;;  %7067 = vmatpush3.bf16.msra.mxu1 %v7750_v63  ;;  %7046 = vmatprep.subr.bf16.mxu0 %v7751_v1  ;;  %v7778_v45 = vld [vmem:[#allocation5 + $0x8a0] sm:$0xff]   ;;  %v7789_v63 = vld [vmem:[#allocation5 + $0x838] sm:$0xff]  }
 0x163   : > { %v4742_v54 = vadd.f32 %v6744_v44, %v6141_v52  ;;  %v6747_v56 = vadd.f32 %v6746_v53, %v6745_v48  ;;  %v6768_v57 = vpop.f32.mrb[3].mxu1  ;;  %7068 = vmatprep.subr.bf16.mxu1 %v7752_v2  ;;  %v7779_v48 = vld [vmem:[#allocation5 + $0x868] sm:$0xff]   ;;  %v236_v1 = vld [vmem:[%s8380_s4 + $0x80] sm:$0xff] }
 0x164   : > { %v6769_v59 = vadd.f32 %v6768_v57, %v6767_v50  ;;  %v7781_v53 = vld [vmem:[#allocation5 + $0x828] sm:$0xff]   ;;  %v7783_v57 = vld [vmem:[#allocation5 + $0x870] sm:$0xff]   ;;  %v268_v2 = vld [vmem:[%s8380_s4 + $0x180] sm:$0xff] }
 0x165   : > { %v8418_v60 = vadd.f32 %v6766_v47, %v4742_v54  ;;  %v4745_v62 = vadd.f32 %v6747_v56, %v6141_v52  ;;  %7047 = vmatpush3.bf16.msra.mxu0 %v7753_v3  ;;  %v237_v3 = vld [vmem:[%s8380_s4 + $0x88] sm:$0xff] }
 0x166   : > { %7069 = vmatpush3.bf16.msra.mxu1 %v7754_v4  ;;  %7048 = vmatprep.subr.bf16.mxu0 %v7755_v5  ;;  %v6174_v4 = vcombine.low %v236_v1, %v268_v2  ;;  %v6175_v5 = vcombine.high %v236_v1, %v268_v2  ;;  %v7823_v1 = vld [vmem:[#allocation5 + $0xa40] sm:$0xff]  }
 0x167   : > { %v8420_v0 = vadd.f32 %v6769_v59, %v4745_v62  ;;  %7070 = vmatprep.subr.bf16.mxu1 %v7756_v6  ;;  %v7785_v59 = vld [vmem:[#allocation5 + $0x830] sm:$0xff]   ;;  %v7788_v62 = vld [vmem:[#allocation5 + $0x8f8] sm:$0xff]   ;;  %v269_v6 = vld [vmem:[%s8380_s4 + $0x188] sm:$0xff] }
 0x168   : > { %v7824_v2 = vld [vmem:[#allocation5 + $0xac0] sm:$0xff]  }
 0x169   : > { %7049 = vmatpush3.bf16.msra.mxu0 %v7757_v7  ;;  %v6176_v7 = vcombine.low %v237_v3, %v269_v6 }
 0x16a   : > { %7071 = vmatpush3.bf16.msra.mxu1 %v7758_v8  ;;  %7078 = vmatprep.subr.bf16.mxu0 %v7759_v17  ;;  %v6177_v8 = vcombine.high %v237_v3, %v269_v6  ;;  %v7799_v17 = vld [vmem:[#allocation5 + $0x950] sm:$0xff]   ;;  %v7825_v3 = vld [vmem:[#allocation5 + $0xa00] sm:$0xff]   ;;  %v7828_v6 = vld [vmem:[#allocation5 + $0xac8] sm:$0xff]  }
 0x16b   : > { %7100 = vmatprep.subr.bf16.mxu1 %v7760_v18  ;;  %v7800_v18 = vld [vmem:[#allocation5 + $0x9d0] sm:$0xff]  }
 0x16c   : > { %5314 = vmatmul.mubr.bf16.vlgmr.msra.gmra.mrb[28].mxu0 %v6170_v13  ;;  %v7795_v13 = vld [vmem:[#allocation5 + $0x948] sm:$0xff]  }
 0x16d   : > { %5355 = vmatmul.mubr.bf16.vlgmr.msra.gmra.mrb[28].mxu1 %v6172_v15  ;;  %7079 = vmatpush3.bf16.msra.mxu0 %v7761_v19  ;;  %v7797_v15 = vld [vmem:[#allocation5 + $0x908] sm:$0xff]   ;;  %v7801_v19 = vld [vmem:[#allocation5 + $0x910] sm:$0xff]  }
 0x16e   : > { %7101 = vmatpush3.bf16.msra.mxu1 %v7762_v20  ;;  %7080 = vmatprep.subr.bf16.mxu0 %v7763_v21  ;;  %v7802_v20 = vld [vmem:[#allocation5 + $0x990] sm:$0xff]   ;;  %v7803_v21 = vld [vmem:[#allocation5 + $0x958] sm:$0xff]  }
 0x16f   : > { %7102 = vmatprep.subr.bf16.mxu1 %v7764_v22  ;;  %5395 = vmatprep.mubr.bf16.mxu0 %v6175_v5  ;;  %v7804_v22 = vld [vmem:[#allocation5 + $0x9d8] sm:$0xff]   ;;  %v7827_v5 = vld [vmem:[#allocation5 + $0xa48] sm:$0xff]  }
 0x170   : > { %5436 = vmatprep.mubr.bf16.mxu1 %v6177_v8  ;;  %v7830_v8 = vld [vmem:[#allocation5 + $0xa88] sm:$0xff]  }
 0x171   : > { %7081 = vmatpush3.bf16.msra.mxu0 %v7765_v23 }
 0x172   : > { %7103 = vmatpush3.bf16.msra.mxu1 %v7766_v24  ;;  %7082 = vmatprep.subr.bf16.mxu0 %v7767_v25  ;;  %v7805_v24 = vld [vmem:[#allocation5 + $0x918] sm:$0xff]  }
 0x173   : > { %7104 = vmatprep.subr.bf16.mxu1 %v7768_v26  ;;  %v7806_v26 = vld [vmem:[#allocation5 + $0x998] sm:$0xff]  }
 0x175   : > { %7083 = vmatpush3.bf16.msra.mxu0 %v7769_v27 }
 0x176   : > { %7105 = vmatpush3.bf16.msra.mxu1 %v7770_v28  ;;  %7084 = vmatprep.subr.bf16.mxu0 %v7771_v29  ;;  %v7807_v28 = vld [vmem:[#allocation5 + $0x960] sm:$0xff]  }
 0x177   : > { %7106 = vmatprep.subr.bf16.mxu1 %v7772_v30 }
 0x179   : > { %7085 = vmatpush3.bf16.msra.mxu0 %v7773_v32 }
 0x17a   : > { %7107 = vmatpush3.bf16.msra.mxu1 %v7774_v34  ;;  %7086 = vmatprep.subr.bf16.mxu0 %v7775_v36  ;;  %v7809_v34 = vld [vmem:[#allocation5 + $0x920] sm:$0xff]  }
 0x17b   : > { %7108 = vmatprep.subr.bf16.mxu1 %v7776_v39 }
 0x17d   : > { %7087 = vmatpush3.bf16.msra.mxu0 %v7777_v42 }
 0x17e   : > { %7109 = vmatpush3.bf16.msra.mxu1 %v7778_v45  ;;  %7088 = vmatprep.subr.bf16.mxu0 %v7779_v48  ;;  %v7813_v45 = vld [vmem:[#allocation5 + $0x928] sm:$0xff]  }
 0x17f   : > { %v6786_v31 = vpop.f32.mrb[4].mxu0  ;;  %7110 = vmatprep.subr.bf16.mxu1 %v7780_v51  ;;  %v7814_v48 = vld [vmem:[#allocation5 + $0x9a8] sm:$0xff]   ;;  %v7817_v51 = vld [vmem:[#allocation5 + $0x930] sm:$0xff]  }
 0x180   : > { %v6808_v33 = vpop.f32.mrb[4].mxu1  ;;  %v6787_v35 = vpop.f32.mrb[5].mxu0 }
 0x181   : > { %v6788_v37 = vadd.f32 %v6787_v35, %v6786_v31  ;;  %v6809_v38 = vpop.f32.mrb[5].mxu1  ;;  %v6789_v41 = vpop.f32.mrb[6].mxu0  ;;  %7089 = vmatpush3.bf16.msra.mxu0 %v7781_v53  ;;  %v7808_v31 = vld [vmem:[#allocation5 + $0x9e0] sm:$0xff]   ;;  %v7819_v53 = vld [vmem:[#allocation5 + $0x978] sm:$0xff]  }
 0x182   : > { %v6810_v40 = vadd.f32 %v6809_v38, %v6808_v33  ;;  %v6811_v44 = vpop.f32.mrb[6].mxu1  ;;  %v6790_v46 = vpop.f32.mrb[7].mxu0  ;;  %7111 = vmatpush3.bf16.msra.mxu1 %v7782_v55  ;;  %7090 = vmatprep.subr.bf16.mxu0 %v7783_v57  ;;  %v7821_v55 = vld [vmem:[#allocation5 + $0x938] sm:$0xff]   ;;  %v238_v57 = vld [vmem:[%s8380_s4 + $0x90] sm:$0xff] }
 0x183   : > { %v4824_v43 = vadd.f32 %v6788_v37, %v8418_v60  ;;  %v6791_v49 = vadd.f32 %v6790_v46, %v6789_v41  ;;  %v6812_v50 = vpop.f32.mrb[7].mxu1  ;;  %7112 = vmatprep.subr.bf16.mxu1 %v7784_v58  ;;  %v7786_v60 = vld [vmem:[#allocation5 + $0x8b0] sm:$0xff]   ;;  %v7810_v37 = vld [vmem:[#allocation5 + $0x9a0] sm:$0xff]  }
 0x184   : > { %v6813_v52 = vadd.f32 %v6812_v50, %v6811_v44  ;;  %v7816_v50 = vld [vmem:[#allocation5 + $0x9f0] sm:$0xff]  }
 0x185   : > { %v8427_v47 = vadd.f32 %v6810_v40, %v4824_v43  ;;  %v4827_v54 = vadd.f32 %v6791_v49, %v8420_v0  ;;  %7091 = vmatpush3.bf16.msra.mxu0 %v7785_v59  ;;  %v7790_v0 = vld [vmem:[#allocation5 + $0x8b8] sm:$0xff]   ;;  %v7811_v40 = vld [vmem:[#allocation5 + $0x968] sm:$0xff]   ;;  %v7815_v49 = vld [vmem:[#allocation5 + $0x970] sm:$0xff]  }
 0x186   : > { %7113 = vmatpush3.bf16.msra.mxu1 %v7786_v60  ;;  %7092 = vmatprep.subr.bf16.mxu0 %v7787_v61  ;;  %v7812_v43 = vld [vmem:[#allocation5 + $0x9e8] sm:$0xff]   ;;  %v270_v58 = vld [vmem:[%s8380_s4 + $0x190] sm:$0xff]  ;;  %v239_v61 = vld [vmem:[%s8380_s4 + $0x98] sm:$0xff] }
 0x187   : > { %v8430_v56 = vadd.f32 %v6813_v52, %v4827_v54  ;;  %7114 = vmatprep.subr.bf16.mxu1 %v7788_v62  ;;  %v7818_v52 = vld [vmem:[#allocation5 + $0x9b0] sm:$0xff]   ;;  %v7820_v54 = vld [vmem:[#allocation5 + $0x9f8] sm:$0xff]   ;;  %v6178_v59 = vcombine.low %v238_v57, %v270_v58  ;;  %v6179_v60 = vcombine.high %v238_v57, %v270_v58  ;;  %v7855_v57 = vld [vmem:[#allocation5 + $0xb40] sm:$0xff]  }
 0x188   : > { %v271_v62 = vld [vmem:[%s8380_s4 + $0x198] sm:$0xff]  ;;  %v7856_v58 = vld [vmem:[#allocation5 + $0xbc0] sm:$0xff]  }
 0x189   : > { %7093 = vmatpush3.bf16.msra.mxu0 %v7789_v63  ;;  %v6180_v63 = vcombine.low %v239_v61, %v271_v62 }
 0x18a   : > { %7115 = vmatpush3.bf16.msra.mxu1 %v7790_v0  ;;  %7122 = vmatprep.subr.bf16.mxu0 %v7791_v9  ;;  %v6181_v0 = vcombine.high %v239_v61, %v271_v62  ;;  %v7831_v9 = vld [vmem:[#allocation5 + $0xa50] sm:$0xff]   ;;  %v7859_v61 = vld [vmem:[#allocation5 + $0xb48] sm:$0xff]  }
 0x18b   : > { %7144 = vmatprep.subr.bf16.mxu1 %v7792_v10  ;;  %v7832_v10 = vld [vmem:[#allocation5 + $0xad0] sm:$0xff]   ;;  %v7860_v62 = vld [vmem:[#allocation5 + $0xbc8] sm:$0xff]  }
 0x18c   : > { %5396 = vmatmul.mubr.bf16.vlgmr.msra.gmra.mrb[32].mxu0 %v6174_v4  ;;  %v7826_v4 = vld [vmem:[#allocation5 + $0xa80] sm:$0xff]  }
 0x18d   : > { %5437 = vmatmul.mubr.bf16.vlgmr.msra.gmra.mrb[32].mxu1 %v6176_v7  ;;  %7123 = vmatpush3.bf16.msra.mxu0 %v7793_v11  ;;  %v7829_v7 = vld [vmem:[#allocation5 + $0xa08] sm:$0xff]   ;;  %v7833_v11 = vld [vmem:[#allocation5 + $0xa10] sm:$0xff]  }
 0x18e   : > { %7145 = vmatpush3.bf16.msra.mxu1 %v7794_v12  ;;  %7124 = vmatprep.subr.bf16.mxu0 %v7795_v13  ;;  %v7834_v12 = vld [vmem:[#allocation5 + $0xa90] sm:$0xff]   ;;  %v7835_v13 = vld [vmem:[#allocation5 + $0xa58] sm:$0xff]  }
 0x18f   : > { %7146 = vmatprep.subr.bf16.mxu1 %v7796_v14  ;;  %5477 = vmatprep.mubr.bf16.mxu0 %v6179_v60  ;;  %v7836_v14 = vld [vmem:[#allocation5 + $0xad8] sm:$0xff]   ;;  %v7858_v60 = vld [vmem:[#allocation5 + $0xb80] sm:$0xff]  }
 0x190   : > { %5518 = vmatprep.mubr.bf16.mxu1 %v6181_v0  ;;  %v7862_v0 = vld [vmem:[#allocation5 + $0xb88] sm:$0xff]  }
 0x191   : > { %7125 = vmatpush3.bf16.msra.mxu0 %v7797_v15 }
 0x192   : > { %7147 = vmatpush3.bf16.msra.mxu1 %v7798_v16  ;;  %7126 = vmatprep.subr.bf16.mxu0 %v7799_v17  ;;  %v7837_v16 = vld [vmem:[#allocation5 + $0xa18] sm:$0xff]  }
 0x193   : > { %7148 = vmatprep.subr.bf16.mxu1 %v7800_v18  ;;  %v7838_v18 = vld [vmem:[#allocation5 + $0xa98] sm:$0xff]  }
 0x195   : > { %7127 = vmatpush3.bf16.msra.mxu0 %v7801_v19 }
 0x196   : > { %7149 = vmatpush3.bf16.msra.mxu1 %v7802_v20  ;;  %7128 = vmatprep.subr.bf16.mxu0 %v7803_v21  ;;  %v7839_v20 = vld [vmem:[#allocation5 + $0xa60] sm:$0xff]  }
 0x197   : > { %7150 = vmatprep.subr.bf16.mxu1 %v7804_v22 }
 0x199   : > { %7129 = vmatpush3.bf16.msra.mxu0 %v7805_v24 }
 0x19a   : > { %7151 = vmatpush3.bf16.msra.mxu1 %v7806_v26  ;;  %7130 = vmatprep.subr.bf16.mxu0 %v7807_v28  ;;  %v7841_v26 = vld [vmem:[#allocation5 + $0xa20] sm:$0xff]  }
 0x19b   : > { %7152 = vmatprep.subr.bf16.mxu1 %v7808_v31 }
 0x19d   : > { %7131 = vmatpush3.bf16.msra.mxu0 %v7809_v34 }
 0x19e   : > { %7153 = vmatpush3.bf16.msra.mxu1 %v7810_v37  ;;  %7132 = vmatprep.subr.bf16.mxu0 %v7811_v40  ;;  %v7845_v37 = vld [vmem:[#allocation5 + $0xa28] sm:$0xff]  }
 0x19f   : > { %v6830_v23 = vpop.f32.mrb[8].mxu0  ;;  %7154 = vmatprep.subr.bf16.mxu1 %v7812_v43  ;;  %v7846_v40 = vld [vmem:[#allocation5 + $0xaa8] sm:$0xff]   ;;  %v7849_v43 = vld [vmem:[#allocation5 + $0xa30] sm:$0xff]  }
 0x1a0   : > { %v6852_v25 = vpop.f32.mrb[8].mxu1  ;;  %v6831_v27 = vpop.f32.mrb[9].mxu0 }
 0x1a1   : > { %v6832_v29 = vadd.f32 %v6831_v27, %v6830_v23  ;;  %v6853_v30 = vpop.f32.mrb[9].mxu1  ;;  %v6833_v33 = vpop.f32.mrb[10].mxu0  ;;  %7133 = vmatpush3.bf16.msra.mxu0 %v7813_v45  ;;  %v7840_v23 = vld [vmem:[#allocation5 + $0xae0] sm:$0xff]   ;;  %v7851_v45 = vld [vmem:[#allocation5 + $0xa78] sm:$0xff]  }
 0x1a2   : > { %v6854_v32 = vadd.f32 %v6853_v30, %v6852_v25  ;;  %v6855_v36 = vpop.f32.mrb[10].mxu1  ;;  %v6834_v38 = vpop.f32.mrb[11].mxu0  ;;  %7155 = vmatpush3.bf16.msra.mxu1 %v7814_v48  ;;  %7134 = vmatprep.subr.bf16.mxu0 %v7815_v49  ;;  %v7853_v48 = vld [vmem:[#allocation5 + $0xa38] sm:$0xff]   ;;  %v240_v49 = vld [vmem:[%s8380_s4 + $0xa0] sm:$0xff] }
 0x1a3   : > { %v4906_v35 = vadd.f32 %v6832_v29, %v8427_v47  ;;  %v6835_v41 = vadd.f32 %v6834_v38, %v6833_v33  ;;  %v6856_v42 = vpop.f32.mrb[11].mxu1  ;;  %7156 = vmatprep.subr.bf16.mxu1 %v7816_v50  ;;  %v7842_v29 = vld [vmem:[#allocation5 + $0xaa0] sm:$0xff]  }
 0x1a4   : > { %v6857_v44 = vadd.f32 %v6856_v42, %v6855_v36  ;;  %v7848_v42 = vld [vmem:[#allocation5 + $0xaf0] sm:$0xff]   ;;  %v272_v50 = vld [vmem:[%s8380_s4 + $0x1a0] sm:$0xff] }
 0x1a5   : > { %v8437_v39 = vadd.f32 %v6854_v32, %v4906_v35  ;;  %v4909_v46 = vadd.f32 %v6835_v41, %v8430_v56  ;;  %7135 = vmatpush3.bf16.msra.mxu0 %v7817_v51  ;;  %v7822_v56 = vld [vmem:[#allocation5 + $0x9b8] sm:$0xff]   ;;  %v7843_v32 = vld [vmem:[#allocation5 + $0xa68] sm:$0xff]   ;;  %v7847_v41 = vld [vmem:[#allocation5 + $0xa70] sm:$0xff]  }
 0x1a6   : > { %7157 = vmatpush3.bf16.msra.mxu1 %v7818_v52  ;;  %7136 = vmatprep.subr.bf16.mxu0 %v7819_v53  ;;  %v7844_v35 = vld [vmem:[#allocation5 + $0xae8] sm:$0xff]   ;;  %v6182_v53 = vcombine.low %v240_v49, %v272_v50 }
 0x1a7   : > { %v8440_v47 = vadd.f32 %v6857_v44, %v4909_v46  ;;  %7158 = vmatprep.subr.bf16.mxu1 %v7820_v54  ;;  %v7850_v44 = vld [vmem:[#allocation5 + $0xab0] sm:$0xff]   ;;  %v7852_v46 = vld [vmem:[#allocation5 + $0xaf8] sm:$0xff]   ;;  %v241_v51 = vld [vmem:[%s8380_s4 + $0xa8] sm:$0xff]  ;;  %v6183_v54 = vcombine.high %v240_v49, %v272_v50 }
 0x1a8   : > { %v273_v52 = vld [vmem:[%s8380_s4 + $0x1a8] sm:$0xff]  ;;  %v7887_v49 = vld [vmem:[#allocation5 + $0xc40] sm:$0xff]  }
 0x1a9   : > { %7137 = vmatpush3.bf16.msra.mxu0 %v7821_v55  ;;  %v6184_v55 = vcombine.low %v241_v51, %v273_v52  ;;  %v7888_v50 = vld [vmem:[#allocation5 + $0xcc0] sm:$0xff]  }
 0x1aa   : > { %7159 = vmatpush3.bf16.msra.mxu1 %v7822_v56  ;;  %7166 = vmatprep.subr.bf16.mxu0 %v7823_v1  ;;  %v6185_v56 = vcombine.high %v241_v51, %v273_v52  ;;  %v7863_v1 = vld [vmem:[#allocation5 + $0xb50] sm:$0xff]   ;;  %v7889_v51 = vld [vmem:[#allocation5 + $0xc00] sm:$0xff]  }
 0x1ab   : > { %7188 = vmatprep.subr.bf16.mxu1 %v7824_v2  ;;  %v7864_v2 = vld [vmem:[#allocation5 + $0xbd0] sm:$0xff]   ;;  %v7890_v52 = vld [vmem:[#allocation5 + $0xc80] sm:$0xff]  }
 0x1ac   : > { %5478 = vmatmul.mubr.bf16.vlgmr.msra.gmra.mrb[36].mxu0 %v6178_v59  ;;  %v7857_v59 = vld [vmem:[#allocation5 + $0xb00] sm:$0xff]  }
 0x1ad   : > { %5519 = vmatmul.mubr.bf16.vlgmr.msra.gmra.mrb[36].mxu1 %v6180_v63  ;;  %7167 = vmatpush3.bf16.msra.mxu0 %v7825_v3  ;;  %v7861_v63 = vld [vmem:[#allocation5 + $0xb08] sm:$0xff]   ;;  %v7865_v3 = vld [vmem:[#allocation5 + $0xb10] sm:$0xff]  }
 0x1ae   : > { %7189 = vmatpush3.bf16.msra.mxu1 %v7826_v4  ;;  %7168 = vmatprep.subr.bf16.mxu0 %v7827_v5  ;;  %v7866_v4 = vld [vmem:[#allocation5 + $0xb90] sm:$0xff]   ;;  %v7867_v5 = vld [vmem:[#allocation5 + $0xb58] sm:$0xff]  }
 0x1af   : > { %7190 = vmatprep.subr.bf16.mxu1 %v7828_v6  ;;  %5559 = vmatprep.mubr.bf16.mxu0 %v6183_v54  ;;  %v7868_v6 = vld [vmem:[#allocation5 + $0xbd8] sm:$0xff]   ;;  %v7892_v54 = vld [vmem:[#allocation5 + $0xcc8] sm:$0xff]  }
 0x1b0   : > { %5600 = vmatprep.mubr.bf16.mxu1 %v6185_v56  ;;  %v7894_v56 = vld [vmem:[#allocation5 + $0xc88] sm:$0xff]  }
 0x1b1   : > { %7169 = vmatpush3.bf16.msra.mxu0 %v7829_v7 }
 0x1b2   : > { %7191 = vmatpush3.bf16.msra.mxu1 %v7830_v8  ;;  %7170 = vmatprep.subr.bf16.mxu0 %v7831_v9  ;;  %v7869_v8 = vld [vmem:[#allocation5 + $0xb18] sm:$0xff]  }
 0x1b3   : > { %7192 = vmatprep.subr.bf16.mxu1 %v7832_v10  ;;  %v7870_v10 = vld [vmem:[#allocation5 + $0xb98] sm:$0xff]  }
 0x1b5   : > { %7171 = vmatpush3.bf16.msra.mxu0 %v7833_v11 }
 0x1b6   : > { %7193 = vmatpush3.bf16.msra.mxu1 %v7834_v12  ;;  %7172 = vmatprep.subr.bf16.mxu0 %v7835_v13  ;;  %v7871_v12 = vld [vmem:[#allocation5 + $0xb60] sm:$0xff]  }
 0x1b7   : > { %7194 = vmatprep.subr.bf16.mxu1 %v7836_v14 }
 0x1b9   : > { %7173 = vmatpush3.bf16.msra.mxu0 %v7837_v16 }
 0x1ba   : > { %7195 = vmatpush3.bf16.msra.mxu1 %v7838_v18  ;;  %7174 = vmatprep.subr.bf16.mxu0 %v7839_v20  ;;  %v7873_v18 = vld [vmem:[#allocation5 + $0xb20] sm:$0xff]  }
 0x1bb   : > { %7196 = vmatprep.subr.bf16.mxu1 %v7840_v23 }
 0x1bd   : > { %7175 = vmatpush3.bf16.msra.mxu0 %v7841_v26 }
 0x1be   : > { %7197 = vmatpush3.bf16.msra.mxu1 %v7842_v29  ;;  %7176 = vmatprep.subr.bf16.mxu0 %v7843_v32  ;;  %v7877_v29 = vld [vmem:[#allocation5 + $0xb28] sm:$0xff]  }
 0x1bf   : > { %v6874_v15 = vpop.f32.mrb[12].mxu0  ;;  %7198 = vmatprep.subr.bf16.mxu1 %v7844_v35  ;;  %v7878_v32 = vld [vmem:[#allocation5 + $0xba8] sm:$0xff]   ;;  %v7881_v35 = vld [vmem:[#allocation5 + $0xb30] sm:$0xff]  }
 0x1c0   : > { %v6896_v17 = vpop.f32.mrb[12].mxu1  ;;  %v6875_v19 = vpop.f32.mrb[13].mxu0 }
 0x1c1   : > { %v6876_v21 = vadd.f32 %v6875_v19, %v6874_v15  ;;  %v6897_v22 = vpop.f32.mrb[13].mxu1  ;;  %v6877_v25 = vpop.f32.mrb[14].mxu0  ;;  %7177 = vmatpush3.bf16.msra.mxu0 %v7845_v37  ;;  %v7872_v15 = vld [vmem:[#allocation5 + $0xbe0] sm:$0xff]   ;;  %v7883_v37 = vld [vmem:[#allocation5 + $0xb78] sm:$0xff]  }
 0x1c2   : > { %v6898_v24 = vadd.f32 %v6897_v22, %v6896_v17  ;;  %v6899_v28 = vpop.f32.mrb[14].mxu1  ;;  %v6878_v30 = vpop.f32.mrb[15].mxu0  ;;  %7199 = vmatpush3.bf16.msra.mxu1 %v7846_v40  ;;  %7178 = vmatprep.subr.bf16.mxu0 %v7847_v41  ;;  %v7885_v40 = vld [vmem:[#allocation5 + $0xb38] sm:$0xff]   ;;  %v242_v41 = vld [vmem:[%s8380_s4 + $0xb0] sm:$0xff] }
 0x1c3   : > { %v4988_v27 = vadd.f32 %v6876_v21, %v8437_v39  ;;  %v6879_v33 = vadd.f32 %v6878_v30, %v6877_v25  ;;  %v6900_v34 = vpop.f32.mrb[15].mxu1  ;;  %7200 = vmatprep.subr.bf16.mxu1 %v7848_v42  ;;  %v7874_v21 = vld [vmem:[#allocation5 + $0xba0] sm:$0xff]   ;;  %v274_v42 = vld [vmem:[%s8380_s4 + $0x1b0] sm:$0xff] }
 0x1c4   : > { %v6901_v36 = vadd.f32 %v6900_v34, %v6899_v28  ;;  %v7880_v34 = vld [vmem:[#allocation5 + $0xbf0] sm:$0xff]  }
 0x1c5   : > { %v8447_v31 = vadd.f32 %v6898_v24, %v4988_v27  ;;  %v4991_v38 = vadd.f32 %v6879_v33, %v8440_v47  ;;  %7179 = vmatpush3.bf16.msra.mxu0 %v7849_v43  ;;  %v7854_v47 = vld [vmem:[#allocation5 + $0xab8] sm:$0xff]   ;;  %v7875_v24 = vld [vmem:[#allocation5 + $0xb68] sm:$0xff]   ;;  %v7879_v33 = vld [vmem:[#allocation5 + $0xb70] sm:$0xff]  }
 0x1c6   : > { %7201 = vmatpush3.bf16.msra.mxu1 %v7850_v44  ;;  %7180 = vmatprep.subr.bf16.mxu0 %v7851_v45  ;;  %v7876_v27 = vld [vmem:[#allocation5 + $0xbe8] sm:$0xff]   ;;  %v243_v43 = vld [vmem:[%s8380_s4 + $0xb8] sm:$0xff]  ;;  %v6186_v44 = vcombine.low %v242_v41, %v274_v42  ;;  %v6187_v45 = vcombine.high %v242_v41, %v274_v42  ;;  %v7919_v41 = vld [vmem:[#allocation5 + $0xd40] sm:$0xff]  }
 0x1c7   : > { %v8450_v39 = vadd.f32 %v6901_v36, %v4991_v38  ;;  %7202 = vmatprep.subr.bf16.mxu1 %v7852_v46  ;;  %v7882_v36 = vld [vmem:[#allocation5 + $0xbb0] sm:$0xff]   ;;  %v7884_v38 = vld [vmem:[#allocation5 + $0xbf8] sm:$0xff]   ;;  %v7920_v42 = vld [vmem:[#allocation5 + $0xdc0] sm:$0xff]  }
 0x1c8   : > { %v275_v46 = vld [vmem:[%s8380_s4 + $0x1b8] sm:$0xff] }
 0x1c9   : > { %7181 = vmatpush3.bf16.msra.mxu0 %v7853_v48  ;;  %v6188_v48 = vcombine.low %v243_v43, %v275_v46 }
 0x1ca   : > { %7203 = vmatpush3.bf16.msra.mxu1 %v7854_v47  ;;  %7210 = vmatprep.subr.bf16.mxu0 %v7855_v57  ;;  %v6189_v47 = vcombine.high %v243_v43, %v275_v46  ;;  %v7895_v57 = vld [vmem:[#allocation5 + $0xc50] sm:$0xff]   ;;  %v7921_v43 = vld [vmem:[#allocation5 + $0xd00] sm:$0xff]   ;;  %v7924_v46 = vld [vmem:[#allocation5 + $0xdc8] sm:$0xff]  }
 0x1cb   : > { %7232 = vmatprep.subr.bf16.mxu1 %v7856_v58  ;;  %v7896_v58 = vld [vmem:[#allocation5 + $0xcd0] sm:$0xff]  }
 0x1cc   : > { %5560 = vmatmul.mubr.bf16.vlgmr.msra.gmra.mrb[40].mxu0 %v6182_v53  ;;  %v7891_v53 = vld [vmem:[#allocation5 + $0xc48] sm:$0xff]  }
 0x1cd   : > { %5601 = vmatmul.mubr.bf16.vlgmr.msra.gmra.mrb[40].mxu1 %v6184_v55  ;;  %7211 = vmatpush3.bf16.msra.mxu0 %v7857_v59  ;;  %v7893_v55 = vld [vmem:[#allocation5 + $0xc08] sm:$0xff]   ;;  %v7897_v59 = vld [vmem:[#allocation5 + $0xc10] sm:$0xff]  }
 0x1ce   : > { %7233 = vmatpush3.bf16.msra.mxu1 %v7858_v60  ;;  %7212 = vmatprep.subr.bf16.mxu0 %v7859_v61  ;;  %v7898_v60 = vld [vmem:[#allocation5 + $0xc90] sm:$0xff]   ;;  %v7899_v61 = vld [vmem:[#allocation5 + $0xc58] sm:$0xff]  }
 0x1cf   : > { %7234 = vmatprep.subr.bf16.mxu1 %v7860_v62  ;;  %5641 = vmatprep.mubr.bf16.mxu0 %v6187_v45  ;;  %v7900_v62 = vld [vmem:[#allocation5 + $0xcd8] sm:$0xff]   ;;  %v7923_v45 = vld [vmem:[#allocation5 + $0xd48] sm:$0xff]  }
 0x1d0   : > { %5682 = vmatprep.mubr.bf16.mxu1 %v6189_v47  ;;  %v7926_v47 = vld [vmem:[#allocation5 + $0xd88] sm:$0xff]  }
 0x1d1   : > { %7213 = vmatpush3.bf16.msra.mxu0 %v7861_v63 }
 0x1d2   : > { %7235 = vmatpush3.bf16.msra.mxu1 %v7862_v0  ;;  %7214 = vmatprep.subr.bf16.mxu0 %v7863_v1  ;;  %v7901_v0 = vld [vmem:[#allocation5 + $0xc18] sm:$0xff]  }
 0x1d3   : > { %7236 = vmatprep.subr.bf16.mxu1 %v7864_v2  ;;  %v7902_v2 = vld [vmem:[#allocation5 + $0xc98] sm:$0xff]  }
 0x1d5   : > { %7215 = vmatpush3.bf16.msra.mxu0 %v7865_v3 }
 0x1d6   : > { %7237 = vmatpush3.bf16.msra.mxu1 %v7866_v4  ;;  %7216 = vmatprep.subr.bf16.mxu0 %v7867_v5  ;;  %v7903_v4 = vld [vmem:[#allocation5 + $0xc60] sm:$0xff]  }
 0x1d7   : > { %7238 = vmatprep.subr.bf16.mxu1 %v7868_v6 }
 0x1d9   : > { %7217 = vmatpush3.bf16.msra.mxu0 %v7869_v8 }
 0x1da   : > { %7239 = vmatpush3.bf16.msra.mxu1 %v7870_v10  ;;  %7218 = vmatprep.subr.bf16.mxu0 %v7871_v12  ;;  %v7905_v10 = vld [vmem:[#allocation5 + $0xc20] sm:$0xff]  }
 0x1db   : > { %7240 = vmatprep.subr.bf16.mxu1 %v7872_v15 }
 0x1dd   : > { %7219 = vmatpush3.bf16.msra.mxu0 %v7873_v18 }
 0x1de   : > { %7241 = vmatpush3.bf16.msra.mxu1 %v7874_v21  ;;  %7220 = vmatprep.subr.bf16.mxu0 %v7875_v24  ;;  %v7909_v21 = vld [vmem:[#allocation5 + $0xc28] sm:$0xff]  }
 0x1df   : > { %v6918_v7 = vpop.f32.mrb[16].mxu0  ;;  %7242 = vmatprep.subr.bf16.mxu1 %v7876_v27  ;;  %v7910_v24 = vld [vmem:[#allocation5 + $0xca8] sm:$0xff]   ;;  %v7913_v27 = vld [vmem:[#allocation5 + $0xc30] sm:$0xff]  }
 0x1e0   : > { %v6940_v9 = vpop.f32.mrb[16].mxu1  ;;  %v6919_v11 = vpop.f32.mrb[17].mxu0 }
 0x1e1   : > { %v6920_v13 = vadd.f32 %v6919_v11, %v6918_v7  ;;  %v6941_v14 = vpop.f32.mrb[17].mxu1  ;;  %v6921_v17 = vpop.f32.mrb[18].mxu0  ;;  %7221 = vmatpush3.bf16.msra.mxu0 %v7877_v29  ;;  %v7904_v7 = vld [vmem:[#allocation5 + $0xce0] sm:$0xff]   ;;  %v7915_v29 = vld [vmem:[#allocation5 + $0xc78] sm:$0xff]  }
 0x1e2   : > { %v6942_v16 = vadd.f32 %v6941_v14, %v6940_v9  ;;  %v6943_v20 = vpop.f32.mrb[18].mxu1  ;;  %v6922_v22 = vpop.f32.mrb[19].mxu0  ;;  %7243 = vmatpush3.bf16.msra.mxu1 %v7878_v32  ;;  %7222 = vmatprep.subr.bf16.mxu0 %v7879_v33  ;;  %v7917_v32 = vld [vmem:[#allocation5 + $0xc38] sm:$0xff]   ;;  %v244_v33 = vld [vmem:[%s8380_s4 + $0xc0] sm:$0xff] }
 0x1e3   : > { %v5070_v19 = vadd.f32 %v6920_v13, %v8447_v31  ;;  %v6923_v25 = vadd.f32 %v6922_v22, %v6921_v17  ;;  %v6944_v26 = vpop.f32.mrb[19].mxu1  ;;  %7244 = vmatprep.subr.bf16.mxu1 %v7880_v34  ;;  %v7906_v13 = vld [vmem:[#allocation5 + $0xca0] sm:$0xff]  }
 0x1e4   : > { %v6945_v28 = vadd.f32 %v6944_v26, %v6943_v20  ;;  %v7912_v26 = vld [vmem:[#allocation5 + $0xcf0] sm:$0xff]   ;;  %v276_v34 = vld [vmem:[%s8380_s4 + $0x1c0] sm:$0xff] }
 0x1e5   : > { %v8457_v23 = vadd.f32 %v6942_v16, %v5070_v19  ;;  %v5073_v30 = vadd.f32 %v6923_v25, %v8450_v39  ;;  %7223 = vmatpush3.bf16.msra.mxu0 %v7881_v35  ;;  %v7886_v39 = vld [vmem:[#allocation5 + $0xbb8] sm:$0xff]   ;;  %v7907_v16 = vld [vmem:[#allocation5 + $0xc68] sm:$0xff]   ;;  %v7911_v25 = vld [vmem:[#allocation5 + $0xc70] sm:$0xff]   ;;  %v6190_v35 = vcombine.low %v244_v33, %v276_v34 }
 0x1e6   : > { %7245 = vmatpush3.bf16.msra.mxu1 %v7882_v36  ;;  %7224 = vmatprep.subr.bf16.mxu0 %v7883_v37  ;;  %v7908_v19 = vld [vmem:[#allocation5 + $0xce8] sm:$0xff]   ;;  %v6191_v36 = vcombine.high %v244_v33, %v276_v34  ;;  %v7951_v33 = vld [vmem:[#allocation5 + $0xe40] sm:$0xff]  }
 0x1e7   : > { %v8460_v31 = vadd.f32 %v6945_v28, %v5073_v30  ;;  %7246 = vmatprep.subr.bf16.mxu1 %v7884_v38  ;;  %v7914_v28 = vld [vmem:[#allocation5 + $0xcb0] sm:$0xff]   ;;  %v7916_v30 = vld [vmem:[#allocation5 + $0xcf8] sm:$0xff]   ;;  %v245_v37 = vld [vmem:[%s8380_s4 + $0xc8] sm:$0xff] }
 0x1e8   : > { %v277_v38 = vld [vmem:[%s8380_s4 + $0x1c8] sm:$0xff]  ;;  %v7952_v34 = vld [vmem:[#allocation5 + $0xec0] sm:$0xff]  }
 0x1e9   : > { %7225 = vmatpush3.bf16.msra.mxu0 %v7885_v40  ;;  %v6192_v40 = vcombine.low %v245_v37, %v277_v38 }
 0x1ea   : > { %7247 = vmatpush3.bf16.msra.mxu1 %v7886_v39  ;;  %7254 = vmatprep.subr.bf16.mxu0 %v7887_v49  ;;  %v6193_v39 = vcombine.high %v245_v37, %v277_v38  ;;  %v7927_v49 = vld [vmem:[#allocation5 + $0xd50] sm:$0xff]   ;;  %v7955_v37 = vld [vmem:[#allocation5 + $0xe48] sm:$0xff]  }
 0x1eb   : > { %7276 = vmatprep.subr.bf16.mxu1 %v7888_v50  ;;  %v7928_v50 = vld [vmem:[#allocation5 + $0xdd0] sm:$0xff]   ;;  %v7956_v38 = vld [vmem:[#allocation5 + $0xec8] sm:$0xff]  }
 0x1ec   : > { %5642 = vmatmul.mubr.bf16.vlgmr.msra.gmra.mrb[44].mxu0 %v6186_v44  ;;  %v7922_v44 = vld [vmem:[#allocation5 + $0xd80] sm:$0xff]  }
 0x1ed   : > { %5683 = vmatmul.mubr.bf16.vlgmr.msra.gmra.mrb[44].mxu1 %v6188_v48  ;;  %7255 = vmatpush3.bf16.msra.mxu0 %v7889_v51  ;;  %v7925_v48 = vld [vmem:[#allocation5 + $0xd08] sm:$0xff]   ;;  %v7929_v51 = vld [vmem:[#allocation5 + $0xd10] sm:$0xff]  }
 0x1ee   : > { %7277 = vmatpush3.bf16.msra.mxu1 %v7890_v52  ;;  %7256 = vmatprep.subr.bf16.mxu0 %v7891_v53  ;;  %v7930_v52 = vld [vmem:[#allocation5 + $0xd90] sm:$0xff]   ;;  %v7931_v53 = vld [vmem:[#allocation5 + $0xd58] sm:$0xff]  }
 0x1ef   : > { %7278 = vmatprep.subr.bf16.mxu1 %v7892_v54  ;;  %5723 = vmatprep.mubr.bf16.mxu0 %v6191_v36  ;;  %v7932_v54 = vld [vmem:[#allocation5 + $0xdd8] sm:$0xff]   ;;  %v7954_v36 = vld [vmem:[#allocation5 + $0xe80] sm:$0xff]  }
 0x1f0   : > { %5764 = vmatprep.mubr.bf16.mxu1 %v6193_v39  ;;  %v7958_v39 = vld [vmem:[#allocation5 + $0xe88] sm:$0xff]  }
 0x1f1   : > { %7257 = vmatpush3.bf16.msra.mxu0 %v7893_v55 }
 0x1f2   : > { %7279 = vmatpush3.bf16.msra.mxu1 %v7894_v56  ;;  %7258 = vmatprep.subr.bf16.mxu0 %v7895_v57  ;;  %v7933_v56 = vld [vmem:[#allocation5 + $0xd18] sm:$0xff]  }
 0x1f3   : > { %7280 = vmatprep.subr.bf16.mxu1 %v7896_v58  ;;  %v7934_v58 = vld [vmem:[#allocation5 + $0xd98] sm:$0xff]  }
 0x1f5   : > { %7259 = vmatpush3.bf16.msra.mxu0 %v7897_v59 }
 0x1f6   : > { %7281 = vmatpush3.bf16.msra.mxu1 %v7898_v60  ;;  %7260 = vmatprep.subr.bf16.mxu0 %v7899_v61  ;;  %v7935_v60 = vld [vmem:[#allocation5 + $0xd60] sm:$0xff]  }
 0x1f7   : > { %7282 = vmatprep.subr.bf16.mxu1 %v7900_v62 }
 0x1f9   : > { %7261 = vmatpush3.bf16.msra.mxu0 %v7901_v0 }
 0x1fa   : > { %7283 = vmatpush3.bf16.msra.mxu1 %v7902_v2  ;;  %7262 = vmatprep.subr.bf16.mxu0 %v7903_v4  ;;  %v7937_v2 = vld [vmem:[#allocation5 + $0xd20] sm:$0xff]  }
 0x1fb   : > { %7284 = vmatprep.subr.bf16.mxu1 %v7904_v7 }
 0x1fd   : > { %7263 = vmatpush3.bf16.msra.mxu0 %v7905_v10 }
 0x1fe   : > { %7285 = vmatpush3.bf16.msra.mxu1 %v7906_v13  ;;  %7264 = vmatprep.subr.bf16.mxu0 %v7907_v16  ;;  %v7941_v13 = vld [vmem:[#allocation5 + $0xd28] sm:$0xff]  }
 0x1ff   : > { %v6962_v63 = vpop.f32.mrb[20].mxu0  ;;  %7286 = vmatprep.subr.bf16.mxu1 %v7908_v19  ;;  %v7942_v16 = vld [vmem:[#allocation5 + $0xda8] sm:$0xff]   ;;  %v7945_v19 = vld [vmem:[#allocation5 + $0xd30] sm:$0xff]  }
 0x200   : > { %v6984_v1 = vpop.f32.mrb[20].mxu1  ;;  %v6963_v3 = vpop.f32.mrb[21].mxu0 }
 0x201   : > { %v6964_v5 = vadd.f32 %v6963_v3, %v6962_v63  ;;  %v6985_v6 = vpop.f32.mrb[21].mxu1  ;;  %v6965_v9 = vpop.f32.mrb[22].mxu0  ;;  %7265 = vmatpush3.bf16.msra.mxu0 %v7909_v21  ;;  %v7936_v63 = vld [vmem:[#allocation5 + $0xde0] sm:$0xff]   ;;  %v7947_v21 = vld [vmem:[#allocation5 + $0xd78] sm:$0xff]  }
 0x202   : > { %v6986_v8 = vadd.f32 %v6985_v6, %v6984_v1  ;;  %v6987_v12 = vpop.f32.mrb[22].mxu1  ;;  %v6966_v14 = vpop.f32.mrb[23].mxu0  ;;  %7287 = vmatpush3.bf16.msra.mxu1 %v7910_v24  ;;  %7266 = vmatprep.subr.bf16.mxu0 %v7911_v25  ;;  %v7949_v24 = vld [vmem:[#allocation5 + $0xd38] sm:$0xff]   ;;  %v246_v25 = vld [vmem:[%s8380_s4 + $0xd0] sm:$0xff] }
 0x203   : > { %v5152_v11 = vadd.f32 %v6964_v5, %v8457_v23  ;;  %v6967_v17 = vadd.f32 %v6966_v14, %v6965_v9  ;;  %v6988_v18 = vpop.f32.mrb[23].mxu1  ;;  %7288 = vmatprep.subr.bf16.mxu1 %v7912_v26  ;;  %v7938_v5 = vld [vmem:[#allocation5 + $0xda0] sm:$0xff]   ;;  %v278_v26 = vld [vmem:[%s8380_s4 + $0x1d0] sm:$0xff] }
 0x204   : > { %v6989_v20 = vadd.f32 %v6988_v18, %v6987_v12  ;;  %v7944_v18 = vld [vmem:[#allocation5 + $0xdf0] sm:$0xff]  }
 0x205   : > { %v8467_v15 = vadd.f32 %v6986_v8, %v5152_v11  ;;  %v5155_v22 = vadd.f32 %v6967_v17, %v8460_v31  ;;  %7267 = vmatpush3.bf16.msra.mxu0 %v7913_v27  ;;  %v7918_v31 = vld [vmem:[#allocation5 + $0xcb8] sm:$0xff]   ;;  %v7939_v8 = vld [vmem:[#allocation5 + $0xd68] sm:$0xff]   ;;  %v7943_v17 = vld [vmem:[#allocation5 + $0xd70] sm:$0xff]  }
 0x206   : > { %7289 = vmatpush3.bf16.msra.mxu1 %v7914_v28  ;;  %7268 = vmatprep.subr.bf16.mxu0 %v7915_v29  ;;  %v7940_v11 = vld [vmem:[#allocation5 + $0xde8] sm:$0xff]   ;;  %v247_v27 = vld [vmem:[%s8380_s4 + $0xd8] sm:$0xff]  ;;  %v6194_v29 = vcombine.low %v246_v25, %v278_v26 }
 0x207   : > { %v8470_v23 = vadd.f32 %v6989_v20, %v5155_v22  ;;  %7290 = vmatprep.subr.bf16.mxu1 %v7916_v30  ;;  %v7946_v20 = vld [vmem:[#allocation5 + $0xdb0] sm:$0xff]   ;;  %v7948_v22 = vld [vmem:[#allocation5 + $0xdf8] sm:$0xff]   ;;  %v6195_v30 = vcombine.high %v246_v25, %v278_v26  ;;  %v7983_v25 = vld [vmem:[#allocation5 + $0xf40] sm:$0xff]  }
 0x208   : > { %v279_v28 = vld [vmem:[%s8380_s4 + $0x1d8] sm:$0xff]  ;;  %v7984_v26 = vld [vmem:[#allocation5 + $0xfc0] sm:$0xff]  }
 0x209   : > { %7269 = vmatpush3.bf16.msra.mxu0 %v7917_v32  ;;  %v6196_v32 = vcombine.low %v247_v27, %v279_v28 }
 0x20a   : > { %7291 = vmatpush3.bf16.msra.mxu1 %v7918_v31  ;;  %7298 = vmatprep.subr.bf16.mxu0 %v7919_v41  ;;  %v6197_v31 = vcombine.high %v247_v27, %v279_v28  ;;  %v7959_v41 = vld [vmem:[#allocation5 + $0xe50] sm:$0xff]   ;;  %v7985_v27 = vld [vmem:[#allocation5 + $0xf00] sm:$0xff]  }
 0x20b   : > { %7320 = vmatprep.subr.bf16.mxu1 %v7920_v42  ;;  %v7960_v42 = vld [vmem:[#allocation5 + $0xed0] sm:$0xff]   ;;  %v7986_v28 = vld [vmem:[#allocation5 + $0xf80] sm:$0xff]  }
 0x20c   : > { %5724 = vmatmul.mubr.bf16.vlgmr.msra.gmra.mrb[48].mxu0 %v6190_v35  ;;  %v7953_v35 = vld [vmem:[#allocation5 + $0xe00] sm:$0xff]  }
 0x20d   : > { %5765 = vmatmul.mubr.bf16.vlgmr.msra.gmra.mrb[48].mxu1 %v6192_v40  ;;  %7299 = vmatpush3.bf16.msra.mxu0 %v7921_v43  ;;  %v7957_v40 = vld [vmem:[#allocation5 + $0xe08] sm:$0xff]   ;;  %v7961_v43 = vld [vmem:[#allocation5 + $0xe10] sm:$0xff]  }
 0x20e   : > { %7321 = vmatpush3.bf16.msra.mxu1 %v7922_v44  ;;  %7300 = vmatprep.subr.bf16.mxu0 %v7923_v45  ;;  %v7962_v44 = vld [vmem:[#allocation5 + $0xe90] sm:$0xff]   ;;  %v7963_v45 = vld [vmem:[#allocation5 + $0xe58] sm:$0xff]  }
 0x20f   : > { %7322 = vmatprep.subr.bf16.mxu1 %v7924_v46  ;;  %5805 = vmatprep.mubr.bf16.mxu0 %v6195_v30  ;;  %v7964_v46 = vld [vmem:[#allocation5 + $0xed8] sm:$0xff]   ;;  %v7988_v30 = vld [vmem:[#allocation5 + $0xfc8] sm:$0xff]  }
 0x210   : > { %5846 = vmatprep.mubr.bf16.mxu1 %v6197_v31  ;;  %v7990_v31 = vld [vmem:[#allocation5 + $0xf88] sm:$0xff]  }
 0x211   : > { %7301 = vmatpush3.bf16.msra.mxu0 %v7925_v48  ;;  %v7965_v48 = vld [vmem:[#allocation5 + $0xe18] sm:$0xff]  }
 0x212   : > { %7323 = vmatpush3.bf16.msra.mxu1 %v7926_v47  ;;  %7302 = vmatprep.subr.bf16.mxu0 %v7927_v49  ;;  %v7966_v49 = vld [vmem:[#allocation5 + $0xe98] sm:$0xff]  }
 0x213   : > { %7324 = vmatprep.subr.bf16.mxu1 %v7928_v50 }
 0x215   : > { %7303 = vmatpush3.bf16.msra.mxu0 %v7929_v51  ;;  %v7967_v51 = vld [vmem:[#allocation5 + $0xe60] sm:$0xff]  }
 0x216   : > { %7325 = vmatpush3.bf16.msra.mxu1 %v7930_v52  ;;  %7304 = vmatprep.subr.bf16.mxu0 %v7931_v53  ;;  %v7968_v53 = vld [vmem:[#allocation5 + $0xee0] sm:$0xff]  }
 0x217   : > { %7326 = vmatprep.subr.bf16.mxu1 %v7932_v54 }
 0x219   : > { %7305 = vmatpush3.bf16.msra.mxu0 %v7933_v56  ;;  %v7969_v56 = vld [vmem:[#allocation5 + $0xe20] sm:$0xff]  }
 0x21a   : > { %7327 = vmatpush3.bf16.msra.mxu1 %v7934_v58  ;;  %7306 = vmatprep.subr.bf16.mxu0 %v7935_v60 }
 0x21b   : > { %7328 = vmatprep.subr.bf16.mxu1 %v7936_v63 }
 0x21d   : > { %7307 = vmatpush3.bf16.msra.mxu0 %v7937_v2 }
 0x21e   : > { %7329 = vmatpush3.bf16.msra.mxu1 %v7938_v5  ;;  %7308 = vmatprep.subr.bf16.mxu0 %v7939_v8 }
 0x21f   : > { %v7006_v55 = vpop.f32.mrb[24].mxu0  ;;  %7330 = vmatprep.subr.bf16.mxu1 %v7940_v11  ;;  %v7977_v11 = vld [vmem:[#allocation5 + $0xe30] sm:$0xff]  }
 0x220   : > { %v7028_v57 = vpop.f32.mrb[24].mxu1  ;;  %v7007_v59 = vpop.f32.mrb[25].mxu0 }
 0x221   : > { %v7008_v61 = vadd.f32 %v7007_v59, %v7006_v55  ;;  %v7029_v62 = vpop.f32.mrb[25].mxu1  ;;  %v7009_v1 = vpop.f32.mrb[26].mxu0  ;;  %7309 = vmatpush3.bf16.msra.mxu0 %v7941_v13  ;;  %v7970_v59 = vld [vmem:[#allocation5 + $0xea0] sm:$0xff]   ;;  %v7979_v13 = vld [vmem:[#allocation5 + $0xe78] sm:$0xff]  }
 0x222   : > { %v7030_v0 = vadd.f32 %v7029_v62, %v7028_v57  ;;  %v7031_v4 = vpop.f32.mrb[26].mxu1  ;;  %v7010_v6 = vpop.f32.mrb[27].mxu0  ;;  %7331 = vmatpush3.bf16.msra.mxu1 %v7942_v16  ;;  %7310 = vmatprep.subr.bf16.mxu0 %v7943_v17  ;;  %v7971_v62 = vld [vmem:[#allocation5 + $0xe68] sm:$0xff]   ;;  %v7981_v16 = vld [vmem:[#allocation5 + $0xe38] sm:$0xff]   ;;  %v248_v17 = vld [vmem:[%s8380_s4 + $0xe0] sm:$0xff] }
 0x223   : > { %v5234_v3 = vadd.f32 %v7008_v61, %v8467_v15  ;;  %v7011_v9 = vadd.f32 %v7010_v6, %v7009_v1  ;;  %v7032_v10 = vpop.f32.mrb[27].mxu1  ;;  %7332 = vmatprep.subr.bf16.mxu1 %v7944_v18  ;;  %v7972_v1 = vld [vmem:[#allocation5 + $0xee8] sm:$0xff]   ;;  %v280_v18 = vld [vmem:[%s8380_s4 + $0x1e0] sm:$0xff] }
 0x224   : > { %v7033_v12 = vadd.f32 %v7032_v10, %v7031_v4  ;;  %v7973_v4 = vld [vmem:[#allocation5 + $0xe28] sm:$0xff]   ;;  %v7976_v10 = vld [vmem:[#allocation5 + $0xef0] sm:$0xff]  }
 0x225   : > { %v8477_v7 = vadd.f32 %v7030_v0, %v5234_v3  ;;  %v5237_v14 = vadd.f32 %v7011_v9, %v8470_v23  ;;  %7311 = vmatpush3.bf16.msra.mxu0 %v7945_v19  ;;  %v7950_v23 = vld [vmem:[#allocation5 + $0xdb8] sm:$0xff]   ;;  %v7974_v6 = vld [vmem:[#allocation5 + $0xea8] sm:$0xff]   ;;  %v7975_v9 = vld [vmem:[#allocation5 + $0xe70] sm:$0xff]  }
 0x226   : > { %7333 = vmatpush3.bf16.msra.mxu1 %v7946_v20  ;;  %7312 = vmatprep.subr.bf16.mxu0 %v7947_v21  ;;  %v249_v19 = vld [vmem:[%s8380_s4 + $0xe8] sm:$0xff]  ;;  %v6198_v20 = vcombine.low %v248_v17, %v280_v18  ;;  %v6199_v21 = vcombine.high %v248_v17, %v280_v18 }
 0x227   : > { %v8480_v15 = vadd.f32 %v7033_v12, %v5237_v14  ;;  %7334 = vmatprep.subr.bf16.mxu1 %v7948_v22  ;;  %v7978_v12 = vld [vmem:[#allocation5 + $0xeb0] sm:$0xff]   ;;  %v7980_v14 = vld [vmem:[#allocation5 + $0xef8] sm:$0xff]   ;;  %v281_v22 = vld [vmem:[%s8380_s4 + $0x1e8] sm:$0xff] }
 0x229   : > { %7313 = vmatpush3.bf16.msra.mxu0 %v7949_v24  ;;  %v6200_v24 = vcombine.low %v249_v19, %v281_v22 }
 0x22a   : > { %7335 = vmatpush3.bf16.msra.mxu1 %v7950_v23  ;;  %7342 = vmatprep.subr.bf16.mxu0 %v7951_v33  ;;  %v6201_v23 = vcombine.high %v249_v19, %v281_v22  ;;  %v7991_v33 = vld [vmem:[#allocation5 + $0xf50] sm:$0xff]  }
 0x22b   : > { %7364 = vmatprep.subr.bf16.mxu1 %v7952_v34  ;;  %v7992_v34 = vld [vmem:[#allocation5 + $0xfd0] sm:$0xff]  }
 0x22c   : > { %5806 = vmatmul.mubr.bf16.vlgmr.msra.gmra.mrb[52].mxu0 %v6194_v29  ;;  %v7987_v29 = vld [vmem:[#allocation5 + $0xf48] sm:$0xff]  }
 0x22d   : > { %5847 = vmatmul.mubr.bf16.vlgmr.msra.gmra.mrb[52].mxu1 %v6196_v32  ;;  %7343 = vmatpush3.bf16.msra.mxu0 %v7953_v35  ;;  %v7989_v32 = vld [vmem:[#allocation5 + $0xf08] sm:$0xff]   ;;  %v7993_v35 = vld [vmem:[#allocation5 + $0xf10] sm:$0xff]  }
 0x22e   : > { %7365 = vmatpush3.bf16.msra.mxu1 %v7954_v36  ;;  %7344 = vmatprep.subr.bf16.mxu0 %v7955_v37  ;;  %v7994_v36 = vld [vmem:[#allocation5 + $0xf90] sm:$0xff]   ;;  %v7995_v37 = vld [vmem:[#allocation5 + $0xf58] sm:$0xff]  }
 0x22f   : > { %7366 = vmatprep.subr.bf16.mxu1 %v7956_v38  ;;  %5887 = vmatprep.mubr.bf16.mxu0 %v6199_v21  ;;  %v7996_v38 = vld [vmem:[#allocation5 + $0xfd8] sm:$0xff]  }
 0x230   : > { %5928 = vmatprep.mubr.bf16.mxu1 %v6201_v23 }
 0x231   : > { %7345 = vmatpush3.bf16.msra.mxu0 %v7957_v40 }
 0x232   : > { %7367 = vmatpush3.bf16.msra.mxu1 %v7958_v39  ;;  %7346 = vmatprep.subr.bf16.mxu0 %v7959_v41  ;;  %v7997_v39 = vld [vmem:[#allocation5 + $0xf18] sm:$0xff]  }
 0x233   : > { %7368 = vmatprep.subr.bf16.mxu1 %v7960_v42  ;;  %v7998_v42 = vld [vmem:[#allocation5 + $0xf98] sm:$0xff]  }
 0x235   : > { %7347 = vmatpush3.bf16.msra.mxu0 %v7961_v43 }
 0x236   : > { %7369 = vmatpush3.bf16.msra.mxu1 %v7962_v44  ;;  %7348 = vmatprep.subr.bf16.mxu0 %v7963_v45  ;;  %v7999_v44 = vld [vmem:[#allocation5 + $0xf60] sm:$0xff]  }
 0x237   : > { %7370 = vmatprep.subr.bf16.mxu1 %v7964_v46 }
 0x239   : > { %7349 = vmatpush3.bf16.msra.mxu0 %v7965_v48  ;;  %v8000_v48 = vld [vmem:[#allocation5 + $0xfe0] sm:$0xff]  }
 0x23a   : > { %7371 = vmatpush3.bf16.msra.mxu1 %v7966_v49  ;;  %7350 = vmatprep.subr.bf16.mxu0 %v7967_v51 }
 0x23b   : > { %7372 = vmatprep.subr.bf16.mxu1 %v7968_v53  ;;  %v8002_v53 = vld [vmem:[#allocation5 + $0xfa0] sm:$0xff]  }
 0x23d   : > { %7351 = vmatpush3.bf16.msra.mxu0 %v7969_v56  ;;  %v8003_v56 = vld [vmem:[#allocation5 + $0xf68] sm:$0xff]  }
 0x23e   : > { %7373 = vmatpush3.bf16.msra.mxu1 %v7970_v59  ;;  %7352 = vmatprep.subr.bf16.mxu0 %v7971_v62  ;;  %v8004_v59 = vld [vmem:[#allocation5 + $0xfe8] sm:$0xff]  }
 0x23f   : > { %v7050_v47 = vpop.f32.mrb[28].mxu0  ;;  %7374 = vmatprep.subr.bf16.mxu1 %v7972_v1  ;;  %v8007_v1 = vld [vmem:[#allocation5 + $0xf70] sm:$0xff]  }
 0x240   : > { %v7072_v50 = vpop.f32.mrb[28].mxu1  ;;  %v7051_v52 = vpop.f32.mrb[29].mxu0 }
 0x241   : > { %v7052_v54 = vadd.f32 %v7051_v52, %v7050_v47  ;;  %v7073_v55 = vpop.f32.mrb[29].mxu1  ;;  %v7053_v58 = vpop.f32.mrb[30].mxu0  ;;  %7353 = vmatpush3.bf16.msra.mxu0 %v7973_v4  ;;  %v8010_v4 = vld [vmem:[#allocation5 + $0xfb0] sm:$0xff]  }
 0x242   : > { %v7074_v57 = vadd.f32 %v7073_v55, %v7072_v50  ;;  %v7075_v61 = vpop.f32.mrb[30].mxu1  ;;  %v7054_v63 = vpop.f32.mrb[31].mxu0  ;;  %7375 = vmatpush3.bf16.msra.mxu1 %v7974_v6  ;;  %7354 = vmatprep.subr.bf16.mxu0 %v7975_v9  ;;  %v8001_v50 = vld [vmem:[#allocation5 + $0xf20] sm:$0xff]   ;;  %v8012_v6 = vld [vmem:[#allocation5 + $0xff8] sm:$0xff]  }
 0x243   : > { %v5316_v60 = vadd.f32 %v7052_v54, %v8477_v7  ;;  %v7055_v2 = vadd.f32 %v7054_v63, %v7053_v58  ;;  %v7076_v3 = vpop.f32.mrb[31].mxu1  ;;  %7376 = vmatprep.subr.bf16.mxu1 %v7976_v10  ;;  %v8006_v63 = vld [vmem:[#allocation5 + $0xfa8] sm:$0xff]   ;;  %v8014_v9 = vld [vmem:[#allocation5 + $0xfb8] sm:$0xff]   ;;  %v282_v10 = vld [vmem:[%s8380_s4 + $0x1f0] sm:$0xff] }
 0x244   : > { %v7077_v5 = vadd.f32 %v7076_v3, %v7075_v61  ;;  %v8005_v61 = vld [vmem:[#allocation5 + $0xf28] sm:$0xff]   ;;  %v8009_v3 = vld [vmem:[#allocation5 + $0xf30] sm:$0xff]  }
 0x245   : > { %v8487_v0 = vadd.f32 %v7074_v57, %v5316_v60  ;;  %v5319_v8 = vadd.f32 %v7055_v2, %v8480_v15  ;;  %7355 = vmatpush3.bf16.msra.mxu0 %v7977_v11  ;;  %v7982_v15 = vld [vmem:[#allocation5 + $0xeb8] sm:$0xff]   ;;  %v8008_v2 = vld [vmem:[#allocation5 + $0xff0] sm:$0xff]  }
 0x246   : > { %7377 = vmatpush3.bf16.msra.mxu1 %v7978_v12  ;;  %7356 = vmatprep.subr.bf16.mxu0 %v7979_v13  ;;  %v251_v13 = vld [vmem:[%s8380_s4 + $0xf8] sm:$0xff] }
 0x247   : > { %v8490_v7 = vadd.f32 %v7077_v5, %v5319_v8  ;;  %7378 = vmatprep.subr.bf16.mxu1 %v7980_v14  ;;  %v8011_v5 = vld [vmem:[#allocation5 + $0xf78] sm:$0xff]  }
 0x248   : > { %v8013_v8 = vld [vmem:[#allocation5 + $0xf38] sm:$0xff]  }
 0x249   : > { %7357 = vmatpush3.bf16.msra.mxu0 %v7981_v16  ;;  %v283_v14 = vld [vmem:[%s8380_s4 + $0x1f8] sm:$0xff] }
 0x24a   : > { %7379 = vmatpush3.bf16.msra.mxu1 %v7982_v15  ;;  %7386 = vmatprep.subr.bf16.mxu0 %v7983_v25  ;;  %v6204_v16 = vcombine.low %v251_v13, %v283_v14  ;;  %v6205_v15 = vcombine.high %v251_v13, %v283_v14 }
 0x24b   : > { %7408 = vmatprep.subr.bf16.mxu1 %v7984_v26 }
 0x24c   : > { %5888 = vmatmul.mubr.bf16.vlgmr.msra.gmra.mrb[56].mxu0 %v6198_v20 }
 0x24d   : > { %5929 = vmatmul.mubr.bf16.vlgmr.msra.gmra.mrb[56].mxu1 %v6200_v24  ;;  %7387 = vmatpush3.bf16.msra.mxu0 %v7985_v27 }
 0x24e   : > { %7409 = vmatpush3.bf16.msra.mxu1 %v7986_v28  ;;  %7388 = vmatprep.subr.bf16.mxu0 %v7987_v29 }
 0x24f   : > { %7410 = vmatprep.subr.bf16.mxu1 %v7988_v30  ;;  %6010 = vmatprep.mubr.bf16.mxu1 %v6205_v15 }
 0x251   : > { %7389 = vmatpush3.bf16.msra.mxu0 %v7989_v32 }
 0x252   : > { %7411 = vmatpush3.bf16.msra.mxu1 %v7990_v31  ;;  %7390 = vmatprep.subr.bf16.mxu0 %v7991_v33 }
 0x253   : > { %7412 = vmatprep.subr.bf16.mxu1 %v7992_v34 }
 0x255   : > { %7391 = vmatpush3.bf16.msra.mxu0 %v7993_v35 }
 0x256   : > { %7413 = vmatpush3.bf16.msra.mxu1 %v7994_v36  ;;  %7392 = vmatprep.subr.bf16.mxu0 %v7995_v37 }
 0x257   : > { %7414 = vmatprep.subr.bf16.mxu1 %v7996_v38 }
 0x259   : > { %7393 = vmatpush3.bf16.msra.mxu0 %v7997_v39 }
 0x25a   : > { %7415 = vmatpush3.bf16.msra.mxu1 %v7998_v42  ;;  %7394 = vmatprep.subr.bf16.mxu0 %v7999_v44 }
 0x25b   : > { %7416 = vmatprep.subr.bf16.mxu1 %v8000_v48 }
 0x25d   : > { %7395 = vmatpush3.bf16.msra.mxu0 %v8001_v50 }
 0x25e   : > { %7417 = vmatpush3.bf16.msra.mxu1 %v8002_v53  ;;  %7396 = vmatprep.subr.bf16.mxu0 %v8003_v56 }
 0x25f   : > { %v7094_v40 = vpop.f32.mrb[32].mxu0  ;;  %7418 = vmatprep.subr.bf16.mxu1 %v8004_v59 }
 0x260   : > { %v7116_v41 = vpop.f32.mrb[32].mxu1  ;;  %v7095_v43 = vpop.f32.mrb[33].mxu0 }
 0x261   : > { %v7096_v45 = vadd.f32 %v7095_v43, %v7094_v40  ;;  %v7117_v46 = vpop.f32.mrb[33].mxu1  ;;  %v7097_v49 = vpop.f32.mrb[34].mxu0  ;;  %7397 = vmatpush3.bf16.msra.mxu0 %v8005_v61 }
 0x262   : > { %v7118_v47 = vadd.f32 %v7117_v46, %v7116_v41  ;;  %v7119_v52 = vpop.f32.mrb[34].mxu1  ;;  %v7098_v54 = vpop.f32.mrb[35].mxu0  ;;  %7419 = vmatpush3.bf16.msra.mxu1 %v8006_v63  ;;  %7398 = vmatprep.subr.bf16.mxu0 %v8007_v1 }
 0x263   : > { %v5398_v51 = vadd.f32 %v7096_v45, %v8487_v0  ;;  %v7099_v57 = vadd.f32 %v7098_v54, %v7097_v49  ;;  %v7120_v58 = vpop.f32.mrb[35].mxu1  ;;  %7420 = vmatprep.subr.bf16.mxu1 %v8008_v2 }
 0x264   : > { %v7121_v60 = vadd.f32 %v7120_v58, %v7119_v52 }
 0x265   : > { %v5439_v55 = vadd.f32 %v7118_v47, %v5398_v51  ;;  %v5401_v62 = vadd.f32 %v7099_v57, %v8490_v7  ;;  %7399 = vmatpush3.bf16.msra.mxu0 %v8009_v3  ;;  %v250_v7 = vld [vmem:[%s8380_s4 + $0xf0] sm:$0xff] }
 0x266   : > { %7421 = vmatpush3.bf16.msra.mxu1 %v8010_v4  ;;  %7400 = vmatprep.subr.bf16.mxu0 %v8011_v5  ;;  %v6202_v11 = vcombine.low %v250_v7, %v282_v10  ;;  %v6203_v12 = vcombine.high %v250_v7, %v282_v10 }
 0x267   : > { %v5442_v0 = vadd.f32 %v7121_v60, %v5401_v62  ;;  %7422 = vmatprep.subr.bf16.mxu1 %v8012_v6 }
 0x268   : > { %5969 = vmatprep.mubr.bf16.mxu0 %v6203_v12 }
 0x269   : > { %7401 = vmatpush3.bf16.msra.mxu0 %v8013_v8 }
 0x26a   : > { %7423 = vmatpush3.bf16.msra.mxu1 %v8014_v9 }
 0x26c   : > { %5970 = vmatmul.mubr.bf16.vlgmr.msra.gmra.mrb[60].mxu0 %v6202_v11 }
 0x26d   : > { %6011 = vmatmul.mubr.bf16.vlgmr.msra.gmra.mrb[60].mxu1 %v6204_v16 }
 0x27f   : > { %v7138_v17 = vpop.f32.mrb[36].mxu0 }
 0x280   : > { %v7160_v18 = vpop.f32.mrb[36].mxu1  ;;  %v7139_v19 = vpop.f32.mrb[37].mxu0 }
 0x281   : > { %v7140_v20 = vadd.f32 %v7139_v19, %v7138_v17  ;;  %v7161_v21 = vpop.f32.mrb[37].mxu1  ;;  %v7141_v22 = vpop.f32.mrb[38].mxu0 }
 0x282   : > { %v7162_v24 = vadd.f32 %v7161_v21, %v7160_v18  ;;  %v7163_v23 = vpop.f32.mrb[38].mxu1  ;;  %v7142_v25 = vpop.f32.mrb[39].mxu0 }
 0x283   : > { %v5480_v26 = vadd.f32 %v7140_v20, %v5439_v55  ;;  %v7143_v27 = vadd.f32 %v7142_v25, %v7141_v22  ;;  %v7164_v28 = vpop.f32.mrb[39].mxu1 }
 0x284   : > { %v7165_v29 = vadd.f32 %v7164_v28, %v7163_v23 }
 0x285   : > { %v5521_v30 = vadd.f32 %v7162_v24, %v5480_v26  ;;  %v5483_v32 = vadd.f32 %v7143_v27, %v5442_v0 }
 0x287   : > { %v5524_v31 = vadd.f32 %v7165_v29, %v5483_v32 }
 0x29f   : > { %v7182_v33 = vpop.f32.mrb[40].mxu0 }
 0x2a0   : > { %v7204_v34 = vpop.f32.mrb[40].mxu1  ;;  %v7183_v35 = vpop.f32.mrb[41].mxu0 }
 0x2a1   : > { %v7205_v36 = vpop.f32.mrb[41].mxu1  ;;  %v7184_v37 = vadd.f32 %v7183_v35, %v7182_v33  ;;  %v7185_v40 = vpop.f32.mrb[42].mxu0 }
 0x2a2   : > { %v7206_v38 = vadd.f32 %v7205_v36, %v7204_v34  ;;  %v7207_v39 = vpop.f32.mrb[42].mxu1  ;;  %v7186_v41 = vpop.f32.mrb[43].mxu0 }
 0x2a3   : > { %v7208_v42 = vpop.f32.mrb[43].mxu1  ;;  %v5562_v43 = vadd.f32 %v7184_v37, %v5521_v30  ;;  %v7187_v44 = vadd.f32 %v7186_v41, %v7185_v40 }
 0x2a4   : > { %v7209_v45 = vadd.f32 %v7208_v42, %v7207_v39 }
 0x2a5   : > { %v5603_v46 = vadd.f32 %v7206_v38, %v5562_v43  ;;  %v5565_v48 = vadd.f32 %v7187_v44, %v5524_v31 }
 0x2a7   : > { %v5606_v47 = vadd.f32 %v7209_v45, %v5565_v48 }
 0x2bf   : > { %v7226_v49 = vpop.f32.mrb[44].mxu0 }
 0x2c0   : > { %v7248_v50 = vpop.f32.mrb[44].mxu1  ;;  %v7227_v51 = vpop.f32.mrb[45].mxu0 }
 0x2c1   : > { %v7228_v52 = vadd.f32 %v7227_v51, %v7226_v49  ;;  %v7249_v53 = vpop.f32.mrb[45].mxu1  ;;  %v7229_v54 = vpop.f32.mrb[46].mxu0 }
 0x2c2   : > { %v7250_v55 = vadd.f32 %v7249_v53, %v7248_v50  ;;  %v7251_v56 = vpop.f32.mrb[46].mxu1  ;;  %v7230_v57 = vpop.f32.mrb[47].mxu0 }
 0x2c3   : > { %v5644_v58 = vadd.f32 %v7228_v52, %v5603_v46  ;;  %v7231_v59 = vadd.f32 %v7230_v57, %v7229_v54  ;;  %v7252_v60 = vpop.f32.mrb[47].mxu1 }
 0x2c4   : > { %v7253_v61 = vadd.f32 %v7252_v60, %v7251_v56 }
 0x2c5   : > { %v5685_v62 = vadd.f32 %v7250_v55, %v5644_v58  ;;  %v5647_v63 = vadd.f32 %v7231_v59, %v5606_v47 }
 0x2c7   : > { %v5688_v0 = vadd.f32 %v7253_v61, %v5647_v63 }
 0x2df   : > { %v7270_v1 = vpop.f32.mrb[48].mxu0 }
 0x2e0   : > { %v7292_v2 = vpop.f32.mrb[48].mxu1  ;;  %v7271_v3 = vpop.f32.mrb[49].mxu0 }
 0x2e1   : > { %v7272_v4 = vadd.f32 %v7271_v3, %v7270_v1  ;;  %v7293_v5 = vpop.f32.mrb[49].mxu1  ;;  %v7273_v6 = vpop.f32.mrb[50].mxu0 }
 0x2e2   : > { %v7294_v8 = vadd.f32 %v7293_v5, %v7292_v2  ;;  %v7295_v9 = vpop.f32.mrb[50].mxu1  ;;  %v7274_v7 = vpop.f32.mrb[51].mxu0 }
 0x2e3   : > { %v5726_v10 = vadd.f32 %v7272_v4, %v5685_v62  ;;  %v7275_v11 = vadd.f32 %v7274_v7, %v7273_v6  ;;  %v7296_v12 = vpop.f32.mrb[51].mxu1 }
 0x2e4   : > { %v7297_v13 = vadd.f32 %v7296_v12, %v7295_v9 }
 0x2e5   : > { %v5767_v14 = vadd.f32 %v7294_v8, %v5726_v10  ;;  %v5729_v16 = vadd.f32 %v7275_v11, %v5688_v0 }
 0x2e7   : > { %v5770_v15 = vadd.f32 %v7297_v13, %v5729_v16 }
 0x2ff   : > { %v7314_v17 = vpop.f32.mrb[52].mxu0 }
 0x300   : > { %v7336_v18 = vpop.f32.mrb[52].mxu1  ;;  %v7315_v19 = vpop.f32.mrb[53].mxu0 }
 0x301   : > { %v7337_v20 = vpop.f32.mrb[53].mxu1  ;;  %v7316_v21 = vadd.f32 %v7315_v19, %v7314_v17  ;;  %v7317_v24 = vpop.f32.mrb[54].mxu0 }
 0x302   : > { %v7338_v22 = vadd.f32 %v7337_v20, %v7336_v18  ;;  %v7339_v23 = vpop.f32.mrb[54].mxu1  ;;  %v7318_v25 = vpop.f32.mrb[55].mxu0 }
 0x303   : > { %v7340_v26 = vpop.f32.mrb[55].mxu1  ;;  %v5808_v27 = vadd.f32 %v7316_v21, %v5767_v14  ;;  %v7319_v28 = vadd.f32 %v7318_v25, %v7317_v24 }
 0x304   : > { %v7341_v29 = vadd.f32 %v7340_v26, %v7339_v23 }
 0x305   : > { %v5849_v30 = vadd.f32 %v7338_v22, %v5808_v27  ;;  %v5811_v32 = vadd.f32 %v7319_v28, %v5770_v15 }
 0x307   : > { %v5852_v31 = vadd.f32 %v7341_v29, %v5811_v32 }
 0x31f   : > { %v7358_v33 = vpop.f32.mrb[56].mxu0 }
 0x320   : > { %v7380_v34 = vpop.f32.mrb[56].mxu1  ;;  %v7359_v35 = vpop.f32.mrb[57].mxu0 }
 0x321   : > { %v7360_v36 = vadd.f32 %v7359_v35, %v7358_v33  ;;  %v7381_v37 = vpop.f32.mrb[57].mxu1  ;;  %v7361_v38 = vpop.f32.mrb[58].mxu0 }
 0x322   : > { %v7382_v40 = vadd.f32 %v7381_v37, %v7380_v34  ;;  %v7383_v39 = vpop.f32.mrb[58].mxu1  ;;  %v7362_v41 = vpop.f32.mrb[59].mxu0 }
 0x323   : > { %v5890_v42 = vadd.f32 %v7360_v36, %v5849_v30  ;;  %v7363_v43 = vadd.f32 %v7362_v41, %v7361_v38  ;;  %v7384_v44 = vpop.f32.mrb[59].mxu1 }
 0x324   : > { %v7385_v45 = vadd.f32 %v7384_v44, %v7383_v39 }
 0x325   : > { %v5931_v46 = vadd.f32 %v7382_v40, %v5890_v42  ;;  %v5893_v48 = vadd.f32 %v7363_v43, %v5852_v31 }
 0x327   : > { %v5934_v47 = vadd.f32 %v7385_v45, %v5893_v48 }
 0x33f   : > { %v7402_v49 = vpop.f32.mrb[60].mxu0 }
 0x340   : > { %v7424_v50 = vpop.f32.mrb[60].mxu1  ;;  %v7403_v51 = vpop.f32.mrb[61].mxu0 }
 0x341   : > { %v7404_v52 = vadd.f32 %v7403_v51, %v7402_v49  ;;  %v7425_v53 = vpop.f32.mrb[61].mxu1  ;;  %v7405_v54 = vpop.f32.mrb[62].mxu0 }
 0x342   : > { %v7426_v55 = vadd.f32 %v7425_v53, %v7424_v50  ;;  %v7427_v56 = vpop.f32.mrb[62].mxu1  ;;  %v7406_v57 = vpop.f32.mrb[63].mxu0 }
 0x343   : > { %v5972_v58 = vadd.f32 %v7404_v52, %v5931_v46  ;;  %v7407_v59 = vadd.f32 %v7406_v57, %v7405_v54  ;;  %v7428_v60 = vpop.f32.mrb[63].mxu1 }
 0x344   : > { %v7429_v61 = vadd.f32 %v7428_v60, %v7427_v56 }
 0x345   : > { %v6013_v62 = vadd.f32 %v7426_v55, %v5972_v58  ;;  %v5975_v63 = vadd.f32 %v7407_v59, %v5934_v47 }
 0x347   : > { %6019 = vst [vmem:[%s216_s20] sm:$0xff] %v6013_v62  ;;  %v6016_v0 = vadd.f32 %v7429_v61, %v5975_v63 }
 0x349   : > { %6020 = vst [vmem:[%s216_s20 + $0x8] sm:$0xff] %v6016_v0 }
 0x34a   : > { %8114 = shalt.err (!%p8111_p2)
}
 0x34b   : > { %s8115_s11 = scalar_lea.hbm %s8509_s23, 256  ;;  %s8119_s29 = scalar_lea.hbm %s8556_s3, 512 }
 0x34c   : > { %p8116_p13 = scmp.ne.s32.totalorder %s8509_s23, %s8115_s11  ;;  %p8120_p4 = scmp.lt.u32.totalorder %s8509_s23, %s8556_s3 }
 0x34d   : > { %p8121_p5 = scmp.lt.u32.totalorder %s8119_s29, %s8115_s11  ;;  %p8123_p11 = scmp.lt.u32.totalorder %s8115_s11, %s8509_s23 }
 0x34e   : > { %p8117_p6 = pnand %p8116_p13, %p8570_p0 }
 0x34f   : > { %p8122_p8 = por %p8121_p5, %p8120_p4 }
 0x350   : > { %p8118_p10 = pneg %p8117_p6 }
 0x351   : > { %p8124_p1 = por %p8123_p11, %p8122_p8 }
 0x353   : > { %p8125_p3 = pnand %p8124_p1, %p8118_p10 }
 0x355   : > { %8128 = shalt.err (!%p8125_p3)
}
 0x356   : > { %s8181_s18 = smov 128   ;;  %s8182_s20 = smov 8  }
 0x357   : > { %7440 = dma.vmem_to_hbm [thread:$0]  (%p8570_p0), %s8504_s21, 256, %s8509_s23, %s6022_s6, %s8181_s18, %s8181_s18, %s8182_s20  }
 0x358 PF: > { %s6050_s26 = sand.u32 1, %s8159_s12   ;;  %p8571_p7 = scmp.ne.s32.totalorder %s8561_s19, 0 }
 0x359   : > { %p8572_p9 = scmp.ge.s32.totalorder %s8171_s15, 2  ;;  %s6051_s27 = scalar_lea.sflag [#allocation4], %s6050_s26 }
 0x35b   : > { %p7454_p12 = pnand %p8572_p9, %p8571_p7 }
 0x35d   : > { %8154 = dma.done.wait (!%p7454_p12), %s6051_s27, 256  }
 0x35e   : > { %8156 = vsyncadd (!%p7454_p12), %s6051_s27, 4294967040  ;;  %p17_p2 = scmp.ge.s32.totalorder %s8314_s5, 4   ;;  %s8573_s12 = smov %s8163_s13 }
 0x35f   : > { %s8574_s13 = smov %s8167_s14  ;;  %s8575_s14 = smov %s8330_s8 }
 0x360   : > { %s8576_s15 = smov %s8314_s5  ;;  %19 = sbr.rel (!%p17_p2) target bundleno = 6 (0x6), region = 85 }
 0x367   :  { %6056 = vsyncpa [#allocation3], 1 }
 0x368   :  { %6058 = vsyncpa [#allocation3 + $0x1], 1 }
 0x369   :  { %6059 = vsyncpa [#allocation6], 1 }
 0x36a   :  { %6060 = vsyncpa [#allocation4], 1 }
 0x36b   :  { %6062 = vsyncpa [#allocation4 + $0x1], 1 }

</bundles_post_ra>
